<compile_context>
chip_gen: v7x
topology: tpu7x:2x2x1
jax: 0.10.0
libtpu: 0.0.40
codegen_flags: <defaults>
</compile_context>

<pallas_src>
import functools

import jax
import jax.numpy as jnp
from jax.experimental import pallas as pl
from jax.experimental.pallas import tpu as pltpu


# ----------------------------------------------------------------------------
# Kernel
# ----------------------------------------------------------------------------
def _lora_linear_kernel(x_ref, w_ref, b_ref, a_ref, bb_ref, o_ref,
                        acc_ref, xa_ref, *, tk):
    """Fused linear + LoRA, f32 accumulation over the K grid axis.

    Grid = (M/tm, N/tn, K/tk), K innermost ("arbitrary" reduction).
    a_ref is the full resident (K, R) LoRA-A block; bb_ref already has alpha
    folded in.  The xa scratch is carried across the N axis, so the N axis must
    execute sequentially on one core (see dimension_semantics in the wrapper).
    """
    j = pl.program_id(1)           # N-tile index
    k = pl.program_id(2)           # K-tile index (reduction)
    nk = pl.num_programs(2)

    @pl.when(k == 0)
    def _():
        # Bias folded into the accumulator init (bias tile is resident; free).
        acc_ref[...] = jnp.broadcast_to(b_ref[...], acc_ref.shape)

    @pl.when((j == 0) & (k == 0))
    def _():
        xa_ref[...] = jnp.zeros_like(xa_ref)

    x = x_ref[...]                                     # (tm, tk) bf16

    # Base linear: bf16 operands, f32 accumulation on the MXU.
    acc_ref[...] += jnp.dot(x, w_ref[...],
                            preferred_element_type=jnp.float32)

    # LoRA left factor: accumulate x @ A over K once per row block (j == 0
    # only); the (tm, R) result is reused for every output-column tile j.
    @pl.when(j == 0)
    def _():
        k_off = pl.multiple_of(k * tk, tk)
        a_blk = a_ref[pl.ds(k_off, tk), :]             # slice of resident A
        xa_ref[...] += jnp.dot(x, a_blk,
                               preferred_element_type=jnp.float32)

    # Finalize once per (i, j) output tile: bf16 rank-R matmul (alpha already
    # folded into B on the host), single cast + store.
    @pl.when(k == nk - 1)
    def _():
        lora = jnp.dot(xa_ref[...].astype(jnp.bfloat16), bb_ref[...],
                       preferred_element_type=jnp.float32)   # (tm, tn)
        o_ref[...] = (acc_ref[...] + lora).astype(o_ref.dtype)


# ----------------------------------------------------------------------------
# Host-side helpers
# ----------------------------------------------------------------------------
def prepare_lora_params(w, b, a, bb, alpha):
    """One-time prep of static params (do this OUTSIDE the per-step call).

    w:  (K, N)  == torch weight.T
    b:  (N,)
    a:  (K, R)  LoRA A
    bb: (R, N)  LoRA B
    Returns (w_bf16, bias_f32_(1,N), a_bf16, alphaB_bf16).
    """
    wb = w.astype(jnp.bfloat16)
    ab = a.astype(jnp.bfloat16)
    bb_scaled = (jnp.float32(alpha) * bb.astype(jnp.float32)).astype(jnp.bfloat16)
    b2 = b.astype(jnp.float32).reshape(1, -1)
    return wb, b2, ab, bb_scaled


def _pick_tile(dim, target, align):
    """Largest multiple of `align` that divides `dim` and is <= target
    (falls back to the full dimension, which is always a legal block)."""
    t = min(target, dim)
    t = (t // align) * align
    while t >= align:
        if dim % t == 0:
            return t
        t -= align
    return dim


def _device_defaults():
    """Per-generation tile targets / VMEM limit (review recommendations)."""
    kind = jax.devices()[0].device_kind.lower()
    if "v5 lite" in kind or "v5e" in kind:
        return dict(tm=512, tn=512, tk=512, vmem=64 * 1024 * 1024, two_tc=False)
    if "v6" in kind:
        return dict(tm=512, tn=1024, tk=512, vmem=96 * 1024 * 1024, two_tc=False)
    if "7" in kind:      # v7x: 64 MiB VMEM per TC, 2 TCs per chip
        return dict(tm=512, tn=1024, tk=512, vmem=48 * 1024 * 1024, two_tc=True)
    # Unknown / older generation: conservative 512-class tiles.
    return dict(tm=512, tn=512, tk=512, vmem=64 * 1024 * 1024, two_tc=False)


def linear_with_lora(x, w_bf16, bias2d, a_bf16, alphaB_bf16,
                     *, tm=None, tn=None, tk=None, out_dtype=None):
    """x: (M, K); w_bf16: (K, N); bias2d: (1, N) f32; a_bf16: (K, R);
    alphaB_bf16: (R, N) with alpha pre-folded.  Params come from
    prepare_lora_params()."""
    M, K = x.shape
    Kw, N = w_bf16.shape
    R = a_bf16.shape[1]
    assert Kw == K and a_bf16.shape == (K, R)
    assert alphaB_bf16.shape == (R, N) and bias2d.shape == (1, N)

    cfg = _device_defaults()
    tm = tm if tm is not None else _pick_tile(M, cfg["tm"], 8)
    tn = tn if tn is not None else _pick_tile(N, cfg["tn"], 128)
    tk = tk if tk is not None else _pick_tile(K, cfg["tk"], 128)
    # v7x has two TensorCores sharing the "parallel" M axis: make sure both
    # get work when the problem allows it.
    if cfg["two_tc"] and M // tm < 2 and M >= 2 * 8:
        tm = _pick_tile(M, max(tm // 2, 8), 8)

    # Tiling constraints (full-extent blocks are always legal).
    assert M % tm == 0 and N % tn == 0 and K % tk == 0
    assert (tn % 128 == 0) or (tn == N)
    assert (tk % 128 == 0) or (tk == K)
    assert (tm % 8 == 0) or (tm == M)
    # TODO(synk): add ragged-edge handling (pl.cdiv grid + masking) for shapes
    # with no aligned divisor; _pick_tile currently falls back to full dims.

    out_dtype = out_dtype if out_dtype is not None else x.dtype
    xb = x.astype(jnp.bfloat16)          # activation cast (per call, unavoidable)

    grid = (M // tm, N // tn, K // tk)

    kernel = functools.partial(_lora_linear_kernel, tk=tk)

    return pl.pallas_call(
        kernel,
        out_shape=jax.ShapeDtypeStruct((M, N), out_dtype),
        grid_spec=pltpu.PrefetchScalarGridSpec(
            num_scalar_prefetch=0,
            grid=grid,
            in_specs=[
                pl.BlockSpec((tm, tk), lambda i, j, k: (i, k)),   # x tile
                pl.BlockSpec((tk, tn), lambda i, j, k: (k, j)),   # W tile (pre-T)
                pl.BlockSpec((1, tn), lambda i, j, k: (0, j)),    # bias tile
                pl.BlockSpec((K, R), lambda i, j, k: (0, 0)),     # LoRA A resident
                pl.BlockSpec((R, tn), lambda i, j, k: (0, j)),    # alpha*B tile
            ],
            out_specs=pl.BlockSpec((tm, tn), lambda i, j, k: (i, j)),
            scratch_shapes=[
                pltpu.VMEM((tm, tn), jnp.float32),   # base-matmul accumulator
                pltpu.VMEM((tm, R), jnp.float32),    # x @ A accumulator
            ],
        ),
        compiler_params=pltpu.CompilerParams(
            # M shards across TensorCores; N and K MUST stay sequential because
            # the xa scratch is carried across the N axis.
            dimension_semantics=("parallel", "arbitrary", "arbitrary"),
            vmem_limit_bytes=cfg["vmem"],
        ),
    )(xb, w_bf16, bias2d, a_bf16, alphaB_bf16)


# ----------------------------------------------------------------------------
# Demo / correctness check
# ----------------------------------------------------------------------------
if __name__ == "__main__":
    key = jax.random.PRNGKey(0)
    k_x, k_w, k_b, k_a, k_bb = jax.random.split(key, 5)

    # Small but tile-able demo shapes (lane-dense output: N multiple of 128).
    batch, in_dim, out_dim, rank = 256, 512, 256, 8
    alpha = 2.0

    x = jax.random.normal(k_x, (batch, in_dim), dtype=jnp.float32)
    # torch.nn.Linear weight is (out_dim, in_dim); store transposed (in_dim, out_dim).
    w = jax.random.normal(k_w, (in_dim, out_dim), dtype=jnp.float32) * 0.05
    b = jax.random.normal(k_b, (out_dim,), dtype=jnp.float32) * 0.1
    # LoRA A: kaiming-uniform-like init; B is zeros in the torch __init__, but we
    # use small random values to exercise the LoRA path.
    a = jax.random.uniform(k_a, (in_dim, rank), dtype=jnp.float32,
                           minval=-0.1, maxval=0.1)
    bb = jax.random.normal(k_bb, (rank, out_dim), dtype=jnp.float32) * 0.05

    # One-time static-param prep (outside the per-step call path).
    w_bf16, bias2d, a_bf16, alphaB_bf16 = prepare_lora_params(w, b, a, bb, alpha)
    w_bf16, bias2d, a_bf16, alphaB_bf16 = jax.block_until_ready(
        (w_bf16, bias2d, a_bf16, alphaB_bf16))

    out = linear_with_lora(x, w_bf16, bias2d, a_bf16, alphaB_bf16)
    out = jax.block_until_ready(out)

    # Pure-JAX reference mirroring the kernel's bf16 rounding points
    # (matmul operands bf16, f32 accumulation, xa cast to bf16, alpha in B).
    xb = x.astype(jnp.bfloat16).astype(jnp.float32)
    wb = w.astype(jnp.bfloat16).astype(jnp.float32)
    ab = a.astype(jnp.bfloat16).astype(jnp.float32)
    bbs = (alpha * bb).astype(jnp.bfloat16).astype(jnp.float32)
    xa = (xb @ ab).astype(jnp.bfloat16).astype(jnp.float32)
    ref = xb @ wb + b + xa @ bbs

    assert out.shape == (batch, out_dim)
    max_err = float(jnp.max(jnp.abs(out - ref)))
    assert jnp.allclose(out, ref, atol=2e-2, rtol=2e-2), max_err

    print("KERNEL_OK")
</pallas_src>

<mosaic_0001>
module attributes {stable_mosaic.version = 11 : i64} {
  func.func @_lora_linear_kernel(%arg0: i32, %arg1: i32, %arg2: i32, %arg3: memref<256x512xbf16, #tpu.memory_space<vmem>>, %arg4: memref<512x256xbf16, #tpu.memory_space<vmem>>, %arg5: memref<1x256xf32, #tpu.memory_space<vmem>>, %arg6: memref<512x8xbf16, #tpu.memory_space<vmem>>, %arg7: memref<8x256xbf16, #tpu.memory_space<vmem>>, %arg8: memref<256x256xf32, #tpu.memory_space<vmem>>, %arg9: memref<256x256xf32, #tpu.memory_space<vmem>>, %arg10: memref<256x8xf32, #tpu.memory_space<vmem>>) attributes {dimension_semantics = [#tpu.dimension_semantics<parallel>, #tpu.dimension_semantics<arbitrary>, #tpu.dimension_semantics<arbitrary>], iteration_bounds = array<i64: 1, 1, 1>, scalar_prefetch = 0 : i64, scratch_operands = 2 : i64, tpu.core_type = #tpu.core_type<tc>, window_params = [{transform_indices = @transform_0, window_bounds = array<i64: 256, 512>}, {transform_indices = @transform_1, window_bounds = array<i64: 512, 256>}, {transform_indices = @transform_2, window_bounds = array<i64: 1, 256>}, {pipeline_mode = #tpu.pipeline_mode<synchronous>, transform_indices = @transform_3, window_bounds = array<i64: 512, 8>}, {transform_indices = @transform_4, window_bounds = array<i64: 8, 256>}, {transform_indices = @transform_5, window_bounds = array<i64: 256, 256>}]} {
    %c0_i32 = arith.constant 0 : i32
    %0 = arith.cmpi eq, %arg2, %c0_i32 : i32
    %1 = arith.extui %0 : i1 to i32
    %c0_i32_0 = arith.constant 0 : i32
    %2 = arith.cmpi ne, %1, %c0_i32_0 : i32
    scf.if %2 {
      %c0_15 = arith.constant 0 : index
      %c0_16 = arith.constant 0 : index
      %20 = vector.load %arg5[%c0_15, %c0_16] : memref<1x256xf32, #tpu.memory_space<vmem>>, vector<1x256xf32>
      %21 = vector.shape_cast %20 : vector<1x256xf32> to vector<1x256xf32>
      %22 = vector.broadcast %21 : vector<1x256xf32> to vector<256x256xf32>
      %c0_17 = arith.constant 0 : index
      %c0_18 = arith.constant 0 : index
      %23 = vector.load %arg9[%c0_17, %c0_18] : memref<256x256xf32, #tpu.memory_space<vmem>>, vector<256x256xf32>
      tpu.vector_store %arg9[%c0_17, %c0_18], %22 {strides = array<i32>} : memref<256x256xf32, #tpu.memory_space<vmem>>, vector<256x256xf32>,
    } else {
    }
    %c0_i32_1 = arith.constant 0 : i32
    %3 = arith.cmpi eq, %arg1, %c0_i32_1 : i32
    %c0_i32_2 = arith.constant 0 : i32
    %4 = arith.cmpi eq, %arg2, %c0_i32_2 : i32
    %5 = arith.andi %3, %4 : i1
    %6 = arith.extui %5 : i1 to i32
    %c0_i32_3 = arith.constant 0 : i32
    %7 = arith.cmpi ne, %6, %c0_i32_3 : i32
    scf.if %7 {
      %cst_15 = arith.constant 0.000000e+00 : f32
      %20 = vector.broadcast %cst_15 : f32 to vector<256x8xf32>
      %c0_16 = arith.constant 0 : index
      %c0_17 = arith.constant 0 : index
      %21 = vector.load %arg10[%c0_16, %c0_17] : memref<256x8xf32, #tpu.memory_space<vmem>>, vector<256x8xf32>
      tpu.vector_store %arg10[%c0_16, %c0_17], %20 {strides = array<i32>} : memref<256x8xf32, #tpu.memory_space<vmem>>, vector<256x8xf32>,
    } else {
    }
    %c0 = arith.constant 0 : index
    %c0_4 = arith.constant 0 : index
    %8 = vector.load %arg3[%c0, %c0_4] : memref<256x512xbf16, #tpu.memory_space<vmem>>, vector<256x512xbf16>
    %c0_5 = arith.constant 0 : index
    %c0_6 = arith.constant 0 : index
    %9 = vector.load %arg9[%c0_5, %c0_6] : memref<256x256xf32, #tpu.memory_space<vmem>>, vector<256x256xf32>
    %c0_7 = arith.constant 0 : index
    %c0_8 = arith.constant 0 : index
    %10 = vector.load %arg4[%c0_7, %c0_8] : memref<512x256xbf16, #tpu.memory_space<vmem>>, vector<512x256xbf16>
    %cst = arith.constant dense<0.000000e+00> : vector<256x256xf32>
    %11 = tpu.matmul %8, %10, %cst {dimension_numbers = #tpu.dot_dimension_numbers<[1], [0], [0], [1], [0, 0, 1, 1], [], []>} : vector<256x512xbf16>, vector<512x256xbf16>, vector<256x256xf32> -> vector<256x256xf32>
    %12 = arith.addf %9, %11 : vector<256x256xf32>
    %c0_9 = arith.constant 0 : index
    %c0_10 = arith.constant 0 : index
    %13 = vector.load %arg9[%c0_9, %c0_10] : memref<256x256xf32, #tpu.memory_space<vmem>>, vector<256x256xf32>
    tpu.vector_store %arg9[%c0_9, %c0_10], %12 {strides = array<i32>} : memref<256x256xf32, #tpu.memory_space<vmem>>, vector<256x256xf32>,
    %c0_i32_11 = arith.constant 0 : i32
    %14 = arith.cmpi eq, %arg1, %c0_i32_11 : i32
    %15 = arith.extui %14 : i1 to i32
    %c0_i32_12 = arith.constant 0 : i32
    %16 = arith.cmpi ne, %15, %c0_i32_12 : i32
    scf.if %16 {
      %c512_i32 = arith.constant 512 : i32
      %20 = arith.muli %arg2, %c512_i32 : i32
      %21 = tpu.assume_multiple %20, 512 : i32
      %22 = arith.index_cast %21 : i32 to index
      %c0_15 = arith.constant 0 : index
      %23 = vector.load %arg6[%22, %c0_15] : memref<512x8xbf16, #tpu.memory_space<vmem>>, vector<512x8xbf16>
      %c0_16 = arith.constant 0 : index
      %c0_17 = arith.constant 0 : index
      %24 = vector.load %arg10[%c0_16, %c0_17] : memref<256x8xf32, #tpu.memory_space<vmem>>, vector<256x8xf32>
      %cst_18 = arith.constant dense<0.000000e+00> : vector<256x8xf32>
      %25 = tpu.matmul %8, %23, %cst_18 {dimension_numbers = #tpu.dot_dimension_numbers<[1], [0], [0], [1], [0, 0, 1, 1], [], []>} : vector<256x512xbf16>, vector<512x8xbf16>, vector<256x8xf32> -> vector<256x8xf32>
      %26 = arith.addf %24, %25 : vector<256x8xf32>
      %c0_19 = arith.constant 0 : index
      %c0_20 = arith.constant 0 : index
      %27 = vector.load %arg10[%c0_19, %c0_20] : memref<256x8xf32, #tpu.memory_space<vmem>>, vector<256x8xf32>
      tpu.vector_store %arg10[%c0_19, %c0_20], %26 {strides = array<i32>} : memref<256x8xf32, #tpu.memory_space<vmem>>, vector<256x8xf32>,
    } else {
    }
    %c0_i32_13 = arith.constant 0 : i32
    %17 = arith.cmpi eq, %arg2, %c0_i32_13 : i32
    %18 = arith.extui %17 : i1 to i32
    %c0_i32_14 = arith.constant 0 : i32
    %19 = arith.cmpi ne, %18, %c0_i32_14 : i32
    scf.if %19 {
      %c0_15 = arith.constant 0 : index
      %c0_16 = arith.constant 0 : index
      %20 = vector.load %arg10[%c0_15, %c0_16] : memref<256x8xf32, #tpu.memory_space<vmem>>, vector<256x8xf32>
      %21 = arith.truncf %20 : vector<256x8xf32> to vector<256x8xbf16>
      %c0_17 = arith.constant 0 : index
      %c0_18 = arith.constant 0 : index
      %22 = vector.load %arg7[%c0_17, %c0_18] : memref<8x256xbf16, #tpu.memory_space<vmem>>, vector<8x256xbf16>
      %cst_19 = arith.constant dense<0.000000e+00> : vector<256x256xf32>
      %23 = tpu.matmul %21, %22, %cst_19 {dimension_numbers = #tpu.dot_dimension_numbers<[1], [0], [0], [1], [0, 0, 1, 1], [], []>} : vector<256x8xbf16>, vector<8x256xbf16>, vector<256x256xf32> -> vector<256x256xf32>
      %c0_20 = arith.constant 0 : index
      %c0_21 = arith.constant 0 : index
      %24 = vector.load %arg9[%c0_20, %c0_21] : memref<256x256xf32, #tpu.memory_space<vmem>>, vector<256x256xf32>
      %25 = arith.addf %24, %23 : vector<256x256xf32>
      %c0_22 = arith.constant 0 : index
      %c0_23 = arith.constant 0 : index
      %26 = vector.load %arg8[%c0_22, %c0_23] : memref<256x256xf32, #tpu.memory_space<vmem>>, vector<256x256xf32>
      tpu.vector_store %arg8[%c0_22, %c0_23], %25 {strides = array<i32>} : memref<256x256xf32, #tpu.memory_space<vmem>>, vector<256x256xf32>,
    } else {
    }
    return
  }
  func.func @transform_0(%arg0: i32, %arg1: i32, %arg2: i32) -> (i32, i32) {
    %c0_i32 = arith.constant 0 : i32
    return %arg0, %arg2 : i32, i32
  }
  func.func @transform_1(%arg0: i32, %arg1: i32, %arg2: i32) -> (i32, i32) {
    %c0_i32 = arith.constant 0 : i32
    return %arg2, %arg1 : i32, i32
  }
  func.func @transform_2(%arg0: i32, %arg1: i32, %arg2: i32) -> (i32, i32) {
    %c0_i32 = arith.constant 0 : i32
    %c0_i32_0 = arith.constant 0 : i32
    return %c0_i32, %arg1 : i32, i32
  }
  func.func @transform_3(%arg0: i32, %arg1: i32, %arg2: i32) -> (i32, i32) {
    %c0_i32 = arith.constant 0 : i32
    %c0_i32_0 = arith.constant 0 : i32
    %c0_i32_1 = arith.constant 0 : i32
    return %c0_i32, %c0_i32_0 : i32, i32
  }
  func.func @transform_4(%arg0: i32, %arg1: i32, %arg2: i32) -> (i32, i32) {
    %c0_i32 = arith.constant 0 : i32
    %c0_i32_0 = arith.constant 0 : i32
    return %c0_i32, %arg1 : i32, i32
  }
  func.func @transform_5(%arg0: i32, %arg1: i32, %arg2: i32) -> (i32, i32) {
    %c0_i32 = arith.constant 0 : i32
    return %arg0, %arg1 : i32, i32
  }
}

</mosaic_0001>

<bundles_post_ra>
// kernel: tpu_custom_call.1
= control target key start
LH: loop header
LB: loop body
LE: loop exit
PB: predicated region body
PF: predicated region fallthrough
CT: control target
= control target key end

     0   :  { %10 = vsyncpa [#allocation5], 0  ;;  %s4383_s0 = inlined_call_operand.hbm [shape: bf16[256,512], index: 0, kind: input, shape index: {}]   ;;  %s4384_s1 = inlined_call_operand.hbm [shape: bf16[512,256], index: 1, kind: input, shape index: {}]   ;;  %s4385_s2 = inlined_call_operand.hbm [shape: f32[1,256], index: 2, kind: input, shape index: {}]   ;;  %s4386_s3 = inlined_call_operand.hbm [shape: bf16[512,8], index: 3, kind: input, shape index: {}]   ;;  %s4387_s4 = inlined_call_operand.hbm [shape: bf16[8,256], index: 4, kind: input, shape index: {}]   ;;  %s4388_s5 = inlined_call_operand.hbm [shape: f32[256,256], index: 5, kind: output, shape index: {}]  }
   0x1   :  { %11 = vsyncpa [#allocation8], 0 }
   0x2   :  { %12 = vsyncpa [#allocation11], 0 }
   0x3   :  { %13 = vsyncpa [#allocation6], 0  ;;  %s3729_s18 = smov [#allocation7]   ;;  %s3589_s22 = scalar_lea.hbm %s4384_s1, 8192 }
   0x4   :  { %s31_s19 = sshll.u32 %s3729_s18, 4  ;;  %p3590_p0 = scmp.ne.s32.totalorder %s4384_s1, %s3589_s22  ;;  %s32_s19 = int_to_ptr.vmem [resolvable:$true] %s31_s19 }
   0x5   :  { %p3593_p1 = scmp.lt.u32.totalorder %s3589_s22, %s4384_s1 }
   0x7   :  { %p3595_p2 = pnand %p3593_p1, %p3590_p0 }
   0x9   :  { %3598 = shalt.err (!%p3595_p2)
}
   0xa   :  { %s3599_s27 = scalar_lea.vmem %s32_s19, 8192  ;;  %p3604_p4 = scmp.lt.s32.totalorder %s32_s19, %s32_s19 }
   0xb   :  { %p3600_p3 = scmp.ne.s32.totalorder %s32_s19, %s3599_s27  ;;  %p3605_p5 = scmp.lt.s32.totalorder %s3599_s27, %s3599_s27 }
   0xd   :  { %p3606_p6 = por %p3605_p5, %p3604_p4 }
   0xf   :  { %p3607_p7 = pnand %p3606_p6, %p3600_p3 }
  0x11   :  { %3610 = shalt.err (!%p3607_p7)
}
  0x12   :  { %s3730_s28 = smov 128   ;;  %s3731_s29 = smov 8  }
  0x13   :  { %37 = dma.hbm_to_vmem [thread:$0]  %s4384_s1, 8192, %s32_s19, [#allocation8], %s3730_s28, %s3730_s28, %s3731_s29  }
  0x14   :  { %s3732_s7 = smov [#allocation10]   ;;  %s3611_s11 = scalar_lea.hbm %s4386_s3, 4096 }
  0x15   :  { %s53_s8 = sshll.u32 %s3732_s7, 4  ;;  %p3612_p8 = scmp.ne.s32.totalorder %s4386_s3, %s3611_s11  ;;  %s54_s8 = int_to_ptr.vmem [resolvable:$true] %s53_s8 }
  0x16   :  { %p3615_p9 = scmp.lt.u32.totalorder %s3611_s11, %s4386_s3 }
  0x18   :  { %p3617_p10 = pnand %p3615_p9, %p3612_p8 }
  0x1a   :  { %3620 = shalt.err (!%p3617_p10)
}
  0x1b   :  { %s3621_s16 = scalar_lea.vmem %s54_s8, 4096  ;;  %p3626_p12 = scmp.lt.s32.totalorder %s54_s8, %s54_s8 }
  0x1c   :  { %p3622_p11 = scmp.ne.s32.totalorder %s54_s8, %s3621_s16  ;;  %p3627_p13 = scmp.lt.s32.totalorder %s3621_s16, %s3621_s16 }
  0x1e   :  { %p3628_p0 = por %p3627_p13, %p3626_p12 }
  0x20   :  { %p3629_p1 = pnand %p3628_p0, %p3622_p11 }
  0x22   :  { %3632 = shalt.err (!%p3629_p1)
}
  0x23   :  { %s3733_s1 = smov 64   ;;  %s3734_s17 = smov 4  }
  0x24   :  { %59 = dma.hbm_to_vmem [thread:$0]  %s4386_s3, 4096, %s54_s8, [#allocation11], %s3733_s1, %s3733_s1, %s3734_s17  }
  0x25   :  { %s3735_s20 = smov [#allocation4]   ;;  %s3633_s24 = scalar_lea.hbm %s4383_s0, 8192 }
  0x26   :  { %s19_s21 = sshll.u32 %s3735_s20, 4  ;;  %p3634_p2 = scmp.ne.s32.totalorder %s4383_s0, %s3633_s24  ;;  %s20_s21 = int_to_ptr.vmem [resolvable:$true] %s19_s21 }
  0x27   :  { %p3637_p3 = scmp.lt.u32.totalorder %s3633_s24, %s4383_s0 }
  0x29   :  { %p3639_p4 = pnand %p3637_p3, %p3634_p2 }
  0x2b   :  { %3642 = shalt.err (!%p3639_p4)
}
  0x2c   :  { %s3643_s29 = scalar_lea.vmem %s20_s21, 8192  ;;  %p3648_p6 = scmp.lt.s32.totalorder %s20_s21, %s20_s21 }
  0x2d   :  { %p3644_p5 = scmp.ne.s32.totalorder %s20_s21, %s3643_s29  ;;  %p3649_p7 = scmp.lt.s32.totalorder %s3643_s29, %s3643_s29 }
  0x2f   :  { %p3650_p8 = por %p3649_p7, %p3648_p6 }
  0x31   :  { %p3651_p9 = pnand %p3650_p8, %p3644_p5 }
  0x33   :  { %3654 = shalt.err (!%p3651_p9)
}
  0x34   :  { %s3736_s3 = smov 256   ;;  %s3737_s30 = smov 16  }
  0x35   :  { %25 = dma.hbm_to_vmem [thread:$0]  %s4383_s0, 8192, %s20_s21, [#allocation5], %s3736_s3, %s3736_s3, %s3737_s30  }
  0x36   :  { %s3738_s8 = smov [#allocation9]   ;;  %s3739_s10 = smov [#allocation12]  }
  0x37   :  { %s44_s9 = sshll.u32 %s3738_s8, 4  ;;  %s66_s11 = sshll.u32 %s3739_s10, 4  ;;  %s45_s9 = int_to_ptr.vmem [resolvable:$true] %s44_s9  ;;  %s67_s11 = int_to_ptr.vmem [resolvable:$true] %s66_s11 }
  0x38   :  { %s3655_s14 = scalar_lea.hbm %s4385_s2, 32 }
  0x39   :  { %p3656_p10 = scmp.ne.s32.totalorder %s4385_s2, %s3655_s14  ;;  %p3659_p11 = scmp.lt.u32.totalorder %s3655_s14, %s4385_s2 }
  0x3b   :  { %p3661_p12 = pnand %p3659_p11, %p3656_p10 }
  0x3d   :  { %3664 = shalt.err (!%p3661_p12)
}
  0x3e   :  { %s3665_s0 = scalar_lea.vmem %s45_s9, 32  ;;  %p3670_p0 = scmp.lt.s32.totalorder %s45_s9, %s45_s9 }
  0x3f   :  { %p3666_p13 = scmp.ne.s32.totalorder %s45_s9, %s3665_s0  ;;  %p3671_p1 = scmp.lt.s32.totalorder %s3665_s0, %s3665_s0 }
  0x41   :  { %p3672_p2 = por %p3671_p1, %p3670_p0 }
  0x43   :  { %p3673_p3 = pnand %p3672_p2, %p3666_p13 }
  0x45   :  { %3676 = shalt.err (!%p3673_p3)
}
  0x46   :  { %47 = dma.hbm_to_vmem [thread:$0]  %s4385_s2, 32, %s45_s9, [#allocation8]  }
  0x47   :  { %s3677_s22 = scalar_lea.hbm %s4387_s4, 128 }
  0x48   :  { %p3678_p4 = scmp.ne.s32.totalorder %s4387_s4, %s3677_s22  ;;  %p3681_p5 = scmp.lt.u32.totalorder %s3677_s22, %s4387_s4 }
  0x4a   :  { %p3683_p6 = pnand %p3681_p5, %p3678_p4 }
  0x4c   :  { %3686 = shalt.err (!%p3683_p6)
}
  0x4d   :  { %s3687_s27 = scalar_lea.vmem %s67_s11, 128  ;;  %p3692_p8 = scmp.lt.s32.totalorder %s67_s11, %s67_s11 }
  0x4e   :  { %p3688_p7 = scmp.ne.s32.totalorder %s67_s11, %s3687_s27  ;;  %p3693_p9 = scmp.lt.s32.totalorder %s3687_s27, %s3687_s27 }
  0x50   :  { %p3694_p10 = por %p3693_p9, %p3692_p8 }
  0x52   :  { %p3695_p11 = pnand %p3694_p10, %p3688_p7 }
  0x54   :  { %3698 = shalt.err (!%p3695_p11)
}
  0x55   :  { %69 = dma.hbm_to_vmem [thread:$0]  %s4387_s4, 128, %s67_s11, [#allocation11]  }
  0x56   :  { %3721 = dma.done.wait [#allocation5], 8192  }
  0x57   :  { %3722 = vsyncadd [#allocation5], 4294959104 }
  0x58   :  { %3723 = dma.done.wait [#allocation8], 8224  }
  0x59   :  { %3724 = vsyncadd [#allocation8], 4294959072 }
  0x5a   :  { %3725 = dma.done.wait [#allocation11], 4224  }
  0x5b   :  { %3726 = vsyncadd [#allocation11], 4294963072  ;;  %v3363_v0 = vld [vmem:[#allocation10 + $0x40] sm:$0xff]   ;;  %v3365_v2 = vld [vmem:[#allocation10 + $0x48] sm:$0xff]   ;;  %vm2339_vm0 = vcmask 1043456   ;;  %vm171_vm1 = vcmask 64512  }
  0x5c   :  { %v3364_v1 = vld [vmem:[#allocation10] sm:$0xff]   ;;  %2931 = vmatprep.subr.bf16.mxu1 %v3363_v0  ;;  %v3366_v3 = vld [vmem:[#allocation10 + $0x8] sm:$0xff]   ;;  %v3367_v4 = vld [vmem:[#allocation10 + $0x50] sm:$0xff]   ;;  %s3742_s4 = smov [#allocation13]  }
  0x5d   :  { %2932 = vmatpush3.bf16.msra.mxu1 %v3364_v1  ;;  %v3368_v5 = vld [vmem:[#allocation10 + $0x10] sm:$0xff]   ;;  %v3369_v6 = vld [vmem:[#allocation10 + $0x58] sm:$0xff]   ;;  %v3374_v8 = vld [vmem:[#allocation7 + $0x4] ss:$8 sps:$4 sm:$0xff]   ;;  %s2736_s29 = sshll.u32 %s3742_s4, 4  ;;  %s2737_s29 = int_to_ptr.vmem [resolvable:$true] %s2736_s29 }
  0x5e   :  { %2933 = vmatprep.subr.bf16.mxu1 %v3365_v2  ;;  %v3370_v7 = vld [vmem:[#allocation10 + $0x18] sm:$0xff]   ;;  %v3371_v9 = vld [vmem:[#allocation10 + $0x60] sm:$0xff]   ;;  %1036 = vmatprep.subr.bf16.mxu0 %v3374_v8  ;;  %v3373_v13 = vld [vmem:[#allocation10 + $0x68] sm:$0xff]   ;;  %s3699_s6 = scalar_lea.vmem %s2737_s29, 8192  ;;  %p3704_p13 = scmp.lt.s32.totalorder %s2737_s29, %s2737_s29 }
  0x5f   :  { %v3377_v10 = vld [vmem:[#allocation7] ss:$8 sps:$4 sm:$0xff]   ;;  %v3379_v12 = vld [vmem:[#allocation7 + $0x14] ss:$8 sps:$4 sm:$0xff]   ;;  %v3382_v14 = vld [vmem:[#allocation7 + $0x10] ss:$8 sps:$4 sm:$0xff]   ;;  %p3700_p12 = scmp.ne.s32.totalorder %s2737_s29, %s3699_s6  ;;  %p3705_p0 = scmp.lt.s32.totalorder %s3699_s6, %s3699_s6 }
  0x60   :  { %v3372_v11 = vld [vmem:[#allocation10 + $0x20] sm:$0xff]   ;;  %1037 = vmatpush1.bf16.msra.mxu0 %v3377_v10  ;;  %v3376_v16 = vld [vmem:[#allocation10 + $0x28] sm:$0xff]   ;;  %v3378_v18 = vld [vmem:[#allocation10 + $0x70] sm:$0xff]  }
  0x61   :  { %2934 = vmatpush3.bf16.msra.mxu1 %v3366_v3  ;;  %1038 = vmatprep.subr.bf16.mxu0 %v3379_v12  ;;  %v3384_v15 = vld [vmem:[#allocation7 + $0x24] ss:$8 sps:$4 sm:$0xff]   ;;  %v3387_v17 = vld [vmem:[#allocation7 + $0x20] ss:$8 sps:$4 sm:$0xff]   ;;  %v3381_v20 = vld [vmem:[#allocation10 + $0x30] sm:$0xff]   ;;  %p3706_p1 = por %p3705_p0, %p3704_p13 }
  0x62   :  { %2935 = vmatprep.subr.bf16.mxu1 %v3367_v4  ;;  %v3390_v19 = vld [vmem:[#allocation4 + $0x4] ss:$16 sps:$4 sm:$0xff]   ;;  %v3383_v22 = vld [vmem:[#allocation10 + $0x78] sm:$0xff]   ;;  %v3411_v33 = vld [vmem:[#allocation10 + $0xc8] sm:$0xff]  }
  0x63   :  { %v3392_v21 = vld [vmem:[#allocation7 + $0x34] ss:$8 sps:$4 sm:$0xff]   ;;  %1878 = vmatprep.mubr.bf16.mxu1 %v3390_v19  ;;  %v3395_v23 = vld [vmem:[#allocation7 + $0x30] ss:$8 sps:$4 sm:$0xff]   ;;  %v3396_v24 = vld [vmem:[#allocation7 + $0x44] ss:$8 sps:$4 sm:$0xff]   ;;  %1068 = vmatprep.mubr.bf16.mxu0 %v3390_v19  ;;  %p3707_p2 = pnand %p3706_p1, %p3700_p12 }
  0x64   :  { %1039 = vmatpush1.bf16.msra.mxu0 %v3382_v14  ;;  %v3386_v25 = vld [vmem:[#allocation10 + $0x38] sm:$0xff]   ;;  %v3391_v27 = vld [vmem:[#allocation10 + $0xc0] sm:$0xff]   ;;  %v3414_v35 = vld [vmem:[#allocation10 + $0x88] sm:$0xff]  }
  0x65   :  { %2936 = vmatpush3.bf16.msra.mxu1 %v3368_v5  ;;  %1040 = vmatprep.subr.bf16.mxu0 %v3384_v15  ;;  %v3398_v26 = vld [vmem:[#allocation7 + $0x40] ss:$8 sps:$4 sm:$0xff]   ;;  %v3402_v28 = vld [vmem:[#allocation7 + $0x54] ss:$8 sps:$4 sm:$0xff]   ;;  %v3404_v32 = vld [vmem:[#allocation7 + $0x50] ss:$8 sps:$4 sm:$0xff]  }
  0x66   :  { %2937 = vmatprep.subr.bf16.mxu1 %v3369_v6  ;;  %v3836_v29 = vld [vmem:[#allocation4] ss:$16 sps:$4 sm:$0xff]   ;;  %v3838_v31 = vld [vmem:[#allocation4 + $0x24] ss:$16 sps:$4 sm:$0xff]  }
  0x67   :  { %v3394_v30 = vld [vmem:[#allocation10 + $0x80] sm:$0xff]   ;;  %v3412_v37 = vld [vmem:[#allocation7 + $0x74] ss:$8 sps:$4 sm:$0xff]   ;;  %v3415_v40 = vld [vmem:[#allocation7 + $0x70] ss:$8 sps:$4 sm:$0xff]  }
  0x68   :  { %1041 = vmatpush1.bf16.msra.mxu0 %v3387_v17  ;;  %v3405_v34 = vld [vmem:[#allocation7 + $0x64] ss:$8 sps:$4 sm:$0xff]   ;;  %v3407_v36 = vld [vmem:[#allocation7 + $0x60] ss:$8 sps:$4 sm:$0xff]   ;;  %v3431_v42 = vld [vmem:[#allocation10 + $0xd0] sm:$0xff]  }
  0x69   :  { %2938 = vmatpush3.bf16.msra.mxu1 %v3370_v7  ;;  %1042 = vmatprep.subr.bf16.mxu0 %v3392_v21  ;;  %v3842_v38 = vld [vmem:[#allocation4 + $0x20] ss:$16 sps:$4 sm:$0xff]   ;;  %v3844_v39 = vld [vmem:[#allocation4 + $0x44] ss:$16 sps:$4 sm:$0xff]  }
  0x6a   :  { %2939 = vmatprep.subr.bf16.mxu1 %v3371_v9  ;;  %v3416_v41 = vld [vmem:[#allocation7 + $0x84] ss:$8 sps:$4 sm:$0xff]   ;;  %v3418_v43 = vld [vmem:[#allocation7 + $0x80] ss:$8 sps:$4 sm:$0xff]   ;;  %v3434_v44 = vld [vmem:[#allocation10 + $0x90] sm:$0xff]  }
  0x6b   :  { %v3422_v45 = vld [vmem:[#allocation7 + $0x94] ss:$8 sps:$4 sm:$0xff]   ;;  %v3848_v46 = vld [vmem:[#allocation4 + $0x40] ss:$16 sps:$4 sm:$0xff]   ;;  %v3425_v49 = vld [vmem:[#allocation7 + $0xa4] ss:$8 sps:$4 sm:$0xff]  }
  0x6c   :  { %1043 = vmatpush1.bf16.msra.mxu0 %v3395_v23  ;;  %v3850_v47 = vld [vmem:[#allocation4 + $0x64] ss:$16 sps:$4 sm:$0xff]   ;;  %v3424_v48 = vld [vmem:[#allocation7 + $0x90] ss:$8 sps:$4 sm:$0xff]   ;;  %v3427_v50 = vld [vmem:[#allocation7 + $0xa0] ss:$8 sps:$4 sm:$0xff]  }
  0x6d   :  { %2940 = vmatpush3.bf16.msra.mxu1 %v3372_v11  ;;  %1044 = vmatprep.subr.bf16.mxu0 %v3396_v24  ;;  %v3451_v51 = vld [vmem:[#allocation10 + $0xd8] sm:$0xff]   ;;  %v3856_v55 = vld [vmem:[#allocation4 + $0x84] ss:$16 sps:$4 sm:$0xff]   ;;  %v3470_v0 = vld [vmem:[#allocation10 + $0xe8] sm:$0xff]  }
  0x6e   :  { %2941 = vmatprep.subr.bf16.mxu1 %v3373_v13  ;;  %v3432_v52 = vld [vmem:[#allocation7 + $0xb4] ss:$8 sps:$4 sm:$0xff]   ;;  %v3854_v53 = vld [vmem:[#allocation4 + $0x60] ss:$16 sps:$4 sm:$0xff]   ;;  %v3436_v57 = vld [vmem:[#allocation7 + $0xc4] ss:$8 sps:$4 sm:$0xff]  }
  0x6f   :  { %v3454_v54 = vld [vmem:[#allocation10 + $0x98] sm:$0xff]   ;;  %v3462_v58 = vld [vmem:[#allocation10 + $0xe0] sm:$0xff]   ;;  %v3471_v1 = vld [vmem:[#allocation10 + $0xa8] sm:$0xff]  }
  0x70   :  { %1045 = vmatpush1.bf16.msra.mxu0 %v3398_v26  ;;  %v3435_v56 = vld [vmem:[#allocation7 + $0xb0] ss:$8 sps:$4 sm:$0xff]   ;;  %v3463_v59 = vld [vmem:[#allocation10 + $0xa0] sm:$0xff]   ;;  %v3442_v63 = vld [vmem:[#allocation7 + $0xd4] ss:$8 sps:$4 sm:$0xff]  }
  0x71   :  { %2942 = vmatpush3.bf16.msra.mxu1 %v3376_v16  ;;  %1046 = vmatprep.subr.bf16.mxu0 %v3402_v28  ;;  %v3860_v60 = vld [vmem:[#allocation4 + $0x80] ss:$16 sps:$4 sm:$0xff]   ;;  %v3862_v62 = vld [vmem:[#allocation4 + $0xa4] ss:$16 sps:$4 sm:$0xff]  }
  0x72   :  { %2943 = vmatprep.subr.bf16.mxu1 %v3378_v18  ;;  %v3438_v61 = vld [vmem:[#allocation7 + $0xc0] ss:$8 sps:$4 sm:$0xff]   ;;  %v3444_v2 = vld [vmem:[#allocation7 + $0xd0] ss:$8 sps:$4 sm:$0xff]   ;;  %v3445_v3 = vld [vmem:[#allocation7 + $0xe4] ss:$8 sps:$4 sm:$0xff]  }
  0x73   :  { %v3447_v4 = vld [vmem:[#allocation7 + $0xe0] ss:$8 sps:$4 sm:$0xff]   ;;  %v3478_v5 = vld [vmem:[#allocation10 + $0xf0] sm:$0xff]   ;;  %v3490_v13 = vld [vmem:[#allocation7 + $0x104] ss:$8 sps:$4 sm:$0xff]  }
  0x74   :  { %1047 = vmatpush1.bf16.msra.mxu0 %v3404_v32  ;;  %v3479_v6 = vld [vmem:[#allocation10 + $0xb0] sm:$0xff]   ;;  %v3486_v11 = vld [vmem:[#allocation10 + $0xf8] sm:$0xff]   ;;  %v3499_v19 = vld [vmem:[#allocation7 + $0x124] ss:$8 sps:$4 sm:$0xff]  }
  0x75   :  { %2944 = vmatpush3.bf16.msra.mxu1 %v3381_v20  ;;  %1048 = vmatprep.subr.bf16.mxu0 %v3405_v34  ;;  %v3866_v7 = vld [vmem:[#allocation4 + $0xa0] ss:$16 sps:$4 sm:$0xff]   ;;  %v3452_v8 = vld [vmem:[#allocation7 + $0xf4] ss:$8 sps:$4 sm:$0xff]  }
  0x76   :  { %2945 = vmatprep.subr.bf16.mxu1 %v3383_v22  ;;  %v3868_v9 = vld [vmem:[#allocation4 + $0xc4] ss:$16 sps:$4 sm:$0xff]   ;;  %v3455_v10 = vld [vmem:[#allocation7 + $0xf0] ss:$8 sps:$4 sm:$0xff]   ;;  %v3488_v14 = vld [vmem:[#allocation7 + $0x100] ss:$8 sps:$4 sm:$0xff]  }
  0x77   :  { %v3487_v12 = vld [vmem:[#allocation10 + $0xb8] sm:$0xff]   ;;  %v3875_v17 = vld [vmem:[#allocation4 + $0xe4] ss:$16 sps:$4 sm:$0xff]  }
  0x78   :  { %1049 = vmatpush1.bf16.msra.mxu0 %v3407_v36  ;;  %v3496_v15 = vld [vmem:[#allocation7 + $0x114] ss:$8 sps:$4 sm:$0xff]   ;;  %v3872_v16 = vld [vmem:[#allocation4 + $0xc0] ss:$16 sps:$4 sm:$0xff]  }
  0x79   :  { %2946 = vmatpush3.bf16.msra.mxu1 %v3386_v25  ;;  %1050 = vmatprep.subr.bf16.mxu0 %v3412_v37  ;;  %v3494_v18 = vld [vmem:[#allocation7 + $0x110] ss:$8 sps:$4 sm:$0xff]   ;;  %v3497_v20 = vld [vmem:[#allocation7 + $0x120] ss:$8 sps:$4 sm:$0xff]   ;;  %v3505_v21 = vld [vmem:[#allocation7 + $0x134] ss:$8 sps:$4 sm:$0xff]  }
  0x7a   :  { %3043 = vmatprep.subr.bf16.mxu1 %v3391_v27  ;;  %v3880_v22 = vld [vmem:[#allocation4 + $0xe0] ss:$16 sps:$4 sm:$0xff]   ;;  %v3883_v23 = vld [vmem:[#allocation4 + $0x104] ss:$16 sps:$4 sm:$0xff]  }
  0x7b   :  { %v3503_v24 = vld [vmem:[#allocation7 + $0x130] ss:$8 sps:$4 sm:$0xff]   ;;  %v3508_v25 = vld [vmem:[#allocation7 + $0x144] ss:$8 sps:$4 sm:$0xff]   ;;  %v3506_v26 = vld [vmem:[#allocation7 + $0x140] ss:$8 sps:$4 sm:$0xff]  }
  0x7c   :  { %1879 = vmatmul.mubr.bf16.vlgmr.msra.gmra.mrb[0].mxu1 %v3836_v29  ;;  %1051 = vmatpush1.bf16.msra.mxu0 %v3415_v40  ;;  %v3514_v27 = vld [vmem:[#allocation7 + $0x154] ss:$8 sps:$4 sm:$0xff]   ;;  %v3888_v28 = vld [vmem:[#allocation4 + $0x100] ss:$16 sps:$4 sm:$0xff]   ;;  %v3526_v37 = vld [vmem:[#allocation7 + $0x184] ss:$8 sps:$4 sm:$0xff]  }
  0x7d   :  { %3044 = vmatpush3.bf16.msra.mxu1 %v3394_v30  ;;  %1886 = vmatprep.mubr.bf16.mxu1 %v3838_v31  ;;  %v3512_v30 = vld [vmem:[#allocation7 + $0x150] ss:$8 sps:$4 sm:$0xff]   ;;  %v3515_v32 = vld [vmem:[#allocation7 + $0x160] ss:$8 sps:$4 sm:$0xff]   ;;  %v3532_v40 = vld [vmem:[#allocation7 + $0x194] ss:$8 sps:$4 sm:$0xff]  }
  0x7e   :  { %3045 = vmatprep.subr.bf16.mxu1 %v3411_v33  ;;  %1052 = vmatprep.subr.bf16.mxu0 %v3416_v41  ;;  %v3523_v33 = vld [vmem:[#allocation7 + $0x174] ss:$8 sps:$4 sm:$0xff]   ;;  %v3896_v34 = vld [vmem:[#allocation4 + $0x120] ss:$16 sps:$4 sm:$0xff]  }
  0x7f   :  { %v3521_v36 = vld [vmem:[#allocation7 + $0x170] ss:$8 sps:$4 sm:$0xff]   ;;  %v3906_v41 = vld [vmem:[#allocation4 + $0x164] ss:$16 sps:$4 sm:$0xff]  }
  0x80   :  { %1053 = vmatpush1.bf16.msra.mxu0 %v3418_v43  ;;  %v3535_v43 = vld [vmem:[#allocation7 + $0x1a4] ss:$8 sps:$4 sm:$0xff]  }
  0x81   :  { %3046 = vmatpush3.bf16.msra.mxu1 %v3414_v35  ;;  %1054 = vmatprep.subr.bf16.mxu0 %v3422_v45  ;;  %v3899_v35 = vld [vmem:[#allocation4 + $0x144] ss:$16 sps:$4 sm:$0xff]  }
  0x82   :  { %3047 = vmatprep.subr.bf16.mxu1 %v3431_v42  ;;  %v3530_v42 = vld [vmem:[#allocation7 + $0x190] ss:$8 sps:$4 sm:$0xff]   ;;  %v3541_v45 = vld [vmem:[#allocation7 + $0x1b4] ss:$8 sps:$4 sm:$0xff]  }
  0x84   :  { %1887 = vmatmul.mubr.bf16.gmra.mrb[4].mxu1 %v3842_v38  ;;  %1055 = vmatpush1.bf16.msra.mxu0 %v3424_v48  ;;  %v3539_v48 = vld [vmem:[#allocation7 + $0x1b0] ss:$8 sps:$4 sm:$0xff]  }
  0x85   :  { %1894 = vmatprep.mubr.bf16.mxu1 %v3844_v39  ;;  %3048 = vmatpush3.bf16.msra.mxu1 %v3434_v44  ;;  %v3533_v44 = vld [vmem:[#allocation7 + $0x1a0] ss:$8 sps:$4 sm:$0xff]  }
  0x86   :  { %1056 = vmatprep.subr.bf16.mxu0 %v3425_v49  ;;  %3049 = vmatprep.subr.bf16.mxu1 %v3451_v51  ;;  %v3544_v49 = vld [vmem:[#allocation7 + $0x1c4] ss:$8 sps:$4 sm:$0xff]   ;;  %v3550_v51 = vld [vmem:[#allocation7 + $0x1d4] ss:$8 sps:$4 sm:$0xff]  }
  0x88   :  { %1057 = vmatpush1.bf16.msra.mxu0 %v3427_v50  ;;  %v3542_v50 = vld [vmem:[#allocation7 + $0x1c0] ss:$8 sps:$4 sm:$0xff]  }
  0x89   :  { %3050 = vmatpush3.bf16.msra.mxu1 %v3454_v54  ;;  %1058 = vmatprep.subr.bf16.mxu0 %v3432_v52  ;;  %v3477_v52 = vld [vmem:[#allocation4 + $0x180] ss:$16 sps:$4 sm:$0xff]  }
  0x8a   :  { %3051 = vmatprep.subr.bf16.mxu1 %v3462_v58  ;;  %v3548_v54 = vld [vmem:[#allocation7 + $0x1d0] ss:$8 sps:$4 sm:$0xff]  }
  0x8b   :  { %v3482_v58 = vld [vmem:[#allocation4 + $0x1a0] ss:$16 sps:$4 sm:$0xff]  }
  0x8c   :  { %1895 = vmatmul.mubr.bf16.gmra.mrb[8].mxu1 %v3848_v46  ;;  %1059 = vmatpush1.bf16.msra.mxu0 %v3435_v56  ;;  %v3551_v56 = vld [vmem:[#allocation7 + $0x1e0] ss:$8 sps:$4 sm:$0xff]  }
  0x8d   :  { %1902 = vmatprep.mubr.bf16.mxu1 %v3850_v47  ;;  %1060 = vmatprep.subr.bf16.mxu0 %v3436_v57  ;;  %v3559_v57 = vld [vmem:[#allocation7 + $0x1f4] ss:$8 sps:$4 sm:$0xff]  }
  0x8e   :  { %3052 = vmatpush3.bf16.msra.mxu1 %v3463_v59  ;;  %v3483_v59 = vld [vmem:[#allocation4 + $0x1c4] ss:$16 sps:$4 sm:$0xff]  }
  0x8f   :  { %3053 = vmatprep.subr.bf16.mxu1 %v3470_v0  ;;  %v3502_v0 = vld [vmem:[#allocation4 + $0xc] ss:$16 sps:$4 sm:$0xff]  }
  0x90   :  { %1061 = vmatpush1.bf16.msra.mxu0 %v3438_v61  ;;  %v3485_v61 = vld [vmem:[#allocation4 + $0x1c0] ss:$16 sps:$4 sm:$0xff]  }
  0x91   :  { %1062 = vmatprep.subr.bf16.mxu0 %v3442_v63  ;;  %v3493_v63 = vld [vmem:[#allocation4 + $0x1e0] ss:$16 sps:$4 sm:$0xff]  }
  0x92   :  { %3054 = vmatpush3.bf16.msra.mxu1 %v3471_v1  ;;  %v3500_v1 = vld [vmem:[#allocation4 + $0x8] ss:$16 sps:$4 sm:$0xff]  }
  0x93   :  { %3055 = vmatprep.subr.bf16.mxu1 %v3478_v5  ;;  %v3520_v5 = vld [vmem:[#allocation4 + $0x48] ss:$16 sps:$4 sm:$0xff]  }
  0x94   :  { %1903 = vmatmul.mubr.bf16.gmra.mrb[12].mxu1 %v3854_v53  ;;  %1063 = vmatpush1.bf16.msra.mxu0 %v3444_v2  ;;  %v3509_v2 = vld [vmem:[#allocation4 + $0x2c] ss:$16 sps:$4 sm:$0xff]  }
  0x95   :  { %1910 = vmatprep.mubr.bf16.mxu1 %v3856_v55  ;;  %1064 = vmatprep.subr.bf16.mxu0 %v3445_v3  ;;  %v3511_v3 = vld [vmem:[#allocation4 + $0x28] ss:$16 sps:$4 sm:$0xff]  }
  0x96   :  { %3056 = vmatpush3.bf16.msra.mxu1 %v3479_v6  ;;  %v3527_v6 = vld [vmem:[#allocation4 + $0x6c] ss:$16 sps:$4 sm:$0xff]  }
  0x97   :  { %3057 = vmatprep.subr.bf16.mxu1 %v3486_v11 }
  0x98   :  { %1065 = vmatpush1.bf16.msra.mxu0 %v3447_v4  ;;  %v3518_v4 = vld [vmem:[#allocation4 + $0x4c] ss:$16 sps:$4 sm:$0xff]  }
  0x99   :  { %1066 = vmatprep.subr.bf16.mxu0 %v3452_v8  ;;  %v3536_v8 = vld [vmem:[#allocation4 + $0x8c] ss:$16 sps:$4 sm:$0xff]  }
  0x9a   :  { %3058 = vmatpush3.bf16.msra.mxu1 %v3487_v12 }
  0x9c   :  { %1911 = vmatmul.mubr.bf16.gmra.mrb[16].mxu1 %v3860_v60  ;;  %1067 = vmatpush1.bf16.msra.mxu0 %v3455_v10 }
  0x9d   :  { %1918 = vmatprep.mubr.bf16.mxu1 %v3862_v62  ;;  %1229 = vmatprep.subr.bf16.mxu0 %v3490_v13  ;;  %v3538_v13 = vld [vmem:[#allocation4 + $0x88] ss:$16 sps:$4 sm:$0xff]  }
  0x9f   :  { %1069 = vmatmul.mubr.bf16.vlgmr.msra.gmra.mrb[0].mxu0 %v3836_v29  ;;  %v3891_v29 = vld [vmem:[#allocation4 + $0x124] ss:$16 sps:$4 sm:$0xff]  }
  0xa0   :  { %1078 = vmatprep.mubr.bf16.mxu0 %v3838_v31  ;;  %1230 = vmatpush1.bf16.msra.mxu0 %v3488_v14  ;;  %v3517_v31 = vld [vmem:[#allocation7 + $0x164] ss:$8 sps:$4 sm:$0xff]  }
  0xa1   :  { %1231 = vmatprep.subr.bf16.mxu0 %v3496_v15  ;;  %v3545_v14 = vld [vmem:[#allocation4 + $0xac] ss:$16 sps:$4 sm:$0xff]   ;;  %v3924_v15 = vld [vmem:[#allocation4 + $0xa8] ss:$16 sps:$4 sm:$0xff]  }
  0xa4   :  { %1919 = vmatmul.mubr.bf16.gmra.mrb[20].mxu1 %v3866_v7  ;;  %1232 = vmatpush1.bf16.msra.mxu0 %v3494_v18  ;;  %v3932_v18 = vld [vmem:[#allocation4 + $0xec] ss:$16 sps:$4 sm:$0xff]  }
  0xa5   :  { %1926 = vmatprep.mubr.bf16.mxu1 %v3868_v9  ;;  %1233 = vmatprep.subr.bf16.mxu0 %v3499_v19  ;;  %v3936_v19 = vld [vmem:[#allocation4 + $0xe8] ss:$16 sps:$4 sm:$0xff]  }
  0xa7   :  { %1079 = vmatmul.mubr.bf16.gmra.mrb[4].mxu0 %v3842_v38  ;;  %v3904_v38 = vld [vmem:[#allocation4 + $0x140] ss:$16 sps:$4 sm:$0xff]  }
  0xa8   :  { %1088 = vmatprep.mubr.bf16.mxu0 %v3844_v39  ;;  %1234 = vmatpush1.bf16.msra.mxu0 %v3497_v20  ;;  %v3524_v39 = vld [vmem:[#allocation7 + $0x180] ss:$8 sps:$4 sm:$0xff]   ;;  %v3938_v20 = vld [vmem:[#allocation4 + $0x10c] ss:$16 sps:$4 sm:$0xff]  }
  0xa9   :  { %1235 = vmatprep.subr.bf16.mxu0 %v3505_v21  ;;  %v3942_v21 = vld [vmem:[#allocation4 + $0x108] ss:$16 sps:$4 sm:$0xff]  }
  0xac   :  { %1927 = vmatmul.mubr.bf16.gmra.mrb[24].mxu1 %v3872_v16  ;;  %1236 = vmatpush1.bf16.msra.mxu0 %v3503_v24  ;;  %v3950_v24 = vld [vmem:[#allocation4 + $0x14c] ss:$16 sps:$4 sm:$0xff]  }
  0xad   :  { %1934 = vmatprep.mubr.bf16.mxu1 %v3875_v17  ;;  %1237 = vmatprep.subr.bf16.mxu0 %v3508_v25  ;;  %v3954_v25 = vld [vmem:[#allocation4 + $0x148] ss:$16 sps:$4 sm:$0xff]  }
  0xaf   :  { %1089 = vmatmul.mubr.bf16.gmra.mrb[8].mxu0 %v3848_v46  ;;  %v3474_v46 = vld [vmem:[#allocation4 + $0x160] ss:$16 sps:$4 sm:$0xff]  }
  0xb0   :  { %1098 = vmatprep.mubr.bf16.mxu0 %v3850_v47  ;;  %1238 = vmatpush1.bf16.msra.mxu0 %v3506_v26  ;;  %v3475_v47 = vld [vmem:[#allocation4 + $0x184] ss:$16 sps:$4 sm:$0xff]   ;;  %v3956_v26 = vld [vmem:[#allocation4 + $0x16c] ss:$16 sps:$4 sm:$0xff]  }
  0xb1   :  { %1239 = vmatprep.subr.bf16.mxu0 %v3514_v27  ;;  %v3740_v27 = vmov 0.0  }
  0xb2   :  { %172 = vst.msk [vmem:[#allocation3] sm:$0xff] %vm171_vm1, %v3740_v27  ;;  %173 = vst.msk [vmem:[#allocation3 + $0x8] sm:$0xff] %vm171_vm1, %v3740_v27 }
  0xb3   :  { %174 = vst.msk [vmem:[#allocation3 + $0x10] sm:$0xff] %vm171_vm1, %v3740_v27  ;;  %175 = vst.msk [vmem:[#allocation3 + $0x18] sm:$0xff] %vm171_vm1, %v3740_v27 }
  0xb4   :  { %1935 = vmatmul.mubr.bf16.gmra.mrb[28].mxu1 %v3880_v22  ;;  %1240 = vmatpush1.bf16.msra.mxu0 %v3512_v30  ;;  %176 = vst.msk [vmem:[#allocation3 + $0x20] sm:$0xff] %vm171_vm1, %v3740_v27  ;;  %177 = vst.msk [vmem:[#allocation3 + $0x28] sm:$0xff] %vm171_vm1, %v3740_v27  ;;  %v3992_v30 = vld [vmem:[#allocation4 + $0x168] ss:$16 sps:$4 sm:$0xff]  }
  0xb5   :  { %1942 = vmatprep.mubr.bf16.mxu1 %v3883_v23  ;;  %1241 = vmatprep.subr.bf16.mxu0 %v3517_v31  ;;  %178 = vst.msk [vmem:[#allocation3 + $0x30] sm:$0xff] %vm171_vm1, %v3740_v27  ;;  %179 = vst.msk [vmem:[#allocation3 + $0x38] sm:$0xff] %vm171_vm1, %v3740_v27 }
  0xb6   :  { %180 = vst.msk [vmem:[#allocation3 + $0x40] sm:$0xff] %vm171_vm1, %v3740_v27  ;;  %181 = vst.msk [vmem:[#allocation3 + $0x48] sm:$0xff] %vm171_vm1, %v3740_v27 }
  0xb7   :  { %1099 = vmatmul.mubr.bf16.gmra.mrb[12].mxu0 %v3854_v53  ;;  %v3480_v53 = vld [vmem:[#allocation4 + $0x1a4] ss:$16 sps:$4 sm:$0xff]   ;;  %182 = vst.msk [vmem:[#allocation3 + $0x50] sm:$0xff] %vm171_vm1, %v3740_v27  ;;  %183 = vst.msk [vmem:[#allocation3 + $0x58] sm:$0xff] %vm171_vm1, %v3740_v27 }
  0xb8   :  { %1108 = vmatprep.mubr.bf16.mxu0 %v3856_v55  ;;  %1242 = vmatpush1.bf16.msra.mxu0 %v3515_v32  ;;  %v3553_v55 = vld [vmem:[#allocation7 + $0x1e4] ss:$8 sps:$4 sm:$0xff]   ;;  %184 = vst.msk [vmem:[#allocation3 + $0x60] sm:$0xff] %vm171_vm1, %v3740_v27  ;;  %185 = vst.msk [vmem:[#allocation3 + $0x68] sm:$0xff] %vm171_vm1, %v3740_v27 }
  0xb9   :  { %1243 = vmatprep.subr.bf16.mxu0 %v3523_v33  ;;  %186 = vst.msk [vmem:[#allocation3 + $0x70] sm:$0xff] %vm171_vm1, %v3740_v27  ;;  %187 = vst.msk [vmem:[#allocation3 + $0x78] sm:$0xff] %vm171_vm1, %v3740_v27  ;;  %v3997_v33 = vld [vmem:[#allocation4 + $0x18c] ss:$16 sps:$4 sm:$0xff]  }
  0xba   :  { %188 = vst.msk [vmem:[#allocation3 + $0x80] sm:$0xff] %vm171_vm1, %v3740_v27  ;;  %189 = vst.msk [vmem:[#allocation3 + $0x88] sm:$0xff] %vm171_vm1, %v3740_v27 }
  0xbb   :  { %190 = vst.msk [vmem:[#allocation3 + $0x90] sm:$0xff] %vm171_vm1, %v3740_v27  ;;  %191 = vst.msk [vmem:[#allocation3 + $0x98] sm:$0xff] %vm171_vm1, %v3740_v27 }
  0xbc   :  { %1943 = vmatmul.mubr.bf16.gmra.mrb[32].mxu1 %v3888_v28  ;;  %1244 = vmatpush1.bf16.msra.mxu0 %v3521_v36  ;;  %192 = vst.msk [vmem:[#allocation3 + $0xa0] sm:$0xff] %vm171_vm1, %v3740_v27  ;;  %193 = vst.msk [vmem:[#allocation3 + $0xa8] sm:$0xff] %vm171_vm1, %v3740_v27 }
  0xbd   :  { %1950 = vmatprep.mubr.bf16.mxu1 %v3891_v29  ;;  %1245 = vmatprep.subr.bf16.mxu0 %v3526_v37  ;;  %194 = vst.msk [vmem:[#allocation3 + $0xb0] sm:$0xff] %vm171_vm1, %v3740_v27  ;;  %195 = vst.msk [vmem:[#allocation3 + $0xb8] sm:$0xff] %vm171_vm1, %v3740_v27 }
  0xbe   :  { %196 = vst.msk [vmem:[#allocation3 + $0xc0] sm:$0xff] %vm171_vm1, %v3740_v27  ;;  %197 = vst.msk [vmem:[#allocation3 + $0xc8] sm:$0xff] %vm171_vm1, %v3740_v27 }
  0xbf   :  { %1109 = vmatmul.mubr.bf16.gmra.mrb[16].mxu0 %v3860_v60  ;;  %v3557_v60 = vld [vmem:[#allocation7 + $0x1f0] ss:$8 sps:$4 sm:$0xff]   ;;  %198 = vst.msk [vmem:[#allocation3 + $0xd0] sm:$0xff] %vm171_vm1, %v3740_v27  ;;  %199 = vst.msk [vmem:[#allocation3 + $0xd8] sm:$0xff] %vm171_vm1, %v3740_v27 }
  0xc0   :  { %1118 = vmatprep.mubr.bf16.mxu0 %v3862_v62  ;;  %1246 = vmatpush1.bf16.msra.mxu0 %v3524_v39  ;;  %v3491_v62 = vld [vmem:[#allocation4 + $0x1e4] ss:$16 sps:$4 sm:$0xff]   ;;  %200 = vst.msk [vmem:[#allocation3 + $0xe0] sm:$0xff] %vm171_vm1, %v3740_v27  ;;  %201 = vst.msk [vmem:[#allocation3 + $0xe8] sm:$0xff] %vm171_vm1, %v3740_v27 }
  0xc1   :  { %1247 = vmatprep.subr.bf16.mxu0 %v3532_v40  ;;  %202 = vst.msk [vmem:[#allocation3 + $0xf0] sm:$0xff] %vm171_vm1, %v3740_v27  ;;  %203 = vst.msk [vmem:[#allocation3 + $0xf8] sm:$0xff] %vm171_vm1, %v3740_v27 }
  0xc4   :  { %1951 = vmatmul.mubr.bf16.gmra.mrb[36].mxu1 %v3896_v34  ;;  %1248 = vmatpush1.bf16.msra.mxu0 %v3530_v42 }
  0xc5   :  { %1958 = vmatprep.mubr.bf16.mxu1 %v3899_v35  ;;  %1249 = vmatprep.subr.bf16.mxu0 %v3535_v43 }
  0xc7   :  { %1119 = vmatmul.mubr.bf16.gmra.mrb[20].mxu0 %v3866_v7  ;;  %v3529_v7 = vld [vmem:[#allocation4 + $0x68] ss:$16 sps:$4 sm:$0xff]  }
  0xc8   :  { %1128 = vmatprep.mubr.bf16.mxu0 %v3868_v9  ;;  %1250 = vmatpush1.bf16.msra.mxu0 %v3533_v44  ;;  %v2284_v9 = vld [vmem:[#allocation12] sm:$0xff] }
  0xc9   :  { %1251 = vmatprep.subr.bf16.mxu0 %v3541_v45  ;;  %v2913_v10 = vcombine.high %v2284_v9, %v2284_v9  ;;  %v2912_v11 = vcombine.low %v2284_v9, %v2284_v9 }
  0xcb   :  { %3155 = vmatprep.subr.msk.bf16.mxu1 %vm2339_vm0, %v2913_v10  ;;  %v2341_v12 = vsel %vm2339_vm0, %v2912_v11, 0 }
  0xcc   :  { %1959 = vmatmul.mubr.bf16.gmra.mrb[40].mxu1 %v3904_v38  ;;  %1252 = vmatpush1.bf16.msra.mxu0 %v3539_v48 }
  0xcd   :  { %1966 = vmatprep.mubr.bf16.mxu1 %v3906_v41  ;;  %1253 = vmatprep.subr.bf16.mxu0 %v3544_v49  ;;  %v3581_v49 = vld [vmem:[#allocation4 + $0x1cc] ss:$16 sps:$4 sm:$0xff]  }
  0xcf   :  { %1129 = vmatmul.mubr.bf16.gmra.mrb[24].mxu0 %v3872_v16  ;;  %v3926_v16 = vld [vmem:[#allocation4 + $0xcc] ss:$16 sps:$4 sm:$0xff]  }
  0xd0   :  { %1138 = vmatprep.mubr.bf16.mxu0 %v3875_v17  ;;  %1254 = vmatpush1.bf16.msra.mxu0 %v3542_v50  ;;  %v3930_v17 = vld [vmem:[#allocation4 + $0xc8] ss:$16 sps:$4 sm:$0xff]  }
  0xd1   :  { %1255 = vmatprep.subr.bf16.mxu0 %v3550_v51 }
  0xd4   :  { %1967 = vmatmul.mubr.bf16.gmra.mrb[44].mxu1 %v3474_v46  ;;  %1256 = vmatpush1.bf16.msra.mxu0 %v3548_v54  ;;  %v3583_v54 = vld [vmem:[#allocation4 + $0x1c8] ss:$16 sps:$4 sm:$0xff]  }
  0xd5   :  { %1974 = vmatprep.mubr.bf16.mxu1 %v3475_v47  ;;  %1257 = vmatprep.subr.bf16.mxu0 %v3553_v55 }
  0xd7   :  { %1139 = vmatmul.mubr.bf16.gmra.mrb[28].mxu0 %v3880_v22  ;;  %v3944_v22 = vld [vmem:[#allocation4 + $0x12c] ss:$16 sps:$4 sm:$0xff]  }
  0xd8   :  { %1148 = vmatprep.mubr.bf16.mxu0 %v3883_v23  ;;  %1258 = vmatpush1.bf16.msra.mxu0 %v3551_v56  ;;  %v3948_v23 = vld [vmem:[#allocation4 + $0x128] ss:$16 sps:$4 sm:$0xff]  }
  0xd9   :  { %1259 = vmatprep.subr.bf16.mxu0 %v3559_v57  ;;  %v3584_v57 = vld [vmem:[#allocation4 + $0x1ec] ss:$16 sps:$4 sm:$0xff]  }
  0xdc   :  { %1975 = vmatmul.mubr.bf16.gmra.mrb[48].mxu1 %v3477_v52  ;;  %1260 = vmatpush1.bf16.msra.mxu0 %v3557_v60 }
  0xdd   :  { %1982 = vmatprep.mubr.bf16.mxu1 %v3480_v53  ;;  %2914 = vmatprep.subr.msk.bf16.mxu0 %vm2339_vm0, %v2913_v10 }
  0xdf   :  { %1149 = vmatmul.mubr.bf16.gmra.mrb[32].mxu0 %v3888_v28 }
  0xe0   :  { %1158 = vmatprep.mubr.bf16.mxu0 %v3891_v29 }
  0xe4   :  { %1983 = vmatmul.mubr.bf16.gmra.mrb[52].mxu1 %v3482_v58 }
  0xe5   :  { %1990 = vmatprep.mubr.bf16.mxu1 %v3483_v59 }
  0xe7   :  { %1159 = vmatmul.mubr.bf16.gmra.mrb[36].mxu0 %v3896_v34 }
  0xe8   :  { %1168 = vmatprep.mubr.bf16.mxu0 %v3899_v35 }
  0xec   :  { %1991 = vmatmul.mubr.bf16.gmra.mrb[56].mxu1 %v3485_v61 }
  0xed   :  { %1998 = vmatprep.mubr.bf16.mxu1 %v3491_v62 }
  0xef   :  { %1169 = vmatmul.mubr.bf16.gmra.mrb[40].mxu0 %v3904_v38  ;;  %v4004_v38 = vld [vmem:[#allocation4 + $0x188] ss:$16 sps:$4 sm:$0xff]  }
  0xf0   :  { %1178 = vmatprep.mubr.bf16.mxu0 %v3906_v41  ;;  %v4009_v41 = vld [vmem:[#allocation4 + $0x1ac] ss:$16 sps:$4 sm:$0xff]  }
  0xf4   :  { %1999 = vmatmul.mubr.bf16.gmra.mrb[60].mxu1 %v3493_v63 }
  0xf5   :  { %2039 = vmatprep.mubr.bf16.mxu1 %v3502_v0 }
  0xf7   :  { %1179 = vmatmul.mubr.bf16.gmra.mrb[44].mxu0 %v3474_v46  ;;  %v3580_v46 = vld [vmem:[#allocation4 + $0x1a8] ss:$16 sps:$4 sm:$0xff]  }
  0xf8   :  { %1188 = vmatprep.mubr.bf16.mxu0 %v3475_v47 }
  0xfc   :  { %2040 = vmatmul.mubr.bf16.vlgmr.msra.gmra.mrb[64].mxu1 %v3500_v1 }
  0xfd   :  { %2047 = vmatprep.mubr.bf16.mxu1 %v3509_v2  ;;  %3156 = vmatpush1.bf16.msra.mxu1 %v2341_v12 }
  0xff   :  { %1189 = vmatmul.mubr.bf16.gmra.mrb[48].mxu0 %v3477_v52 }
 0x100   :  { %1198 = vmatprep.mubr.bf16.mxu0 %v3480_v53 }
 0x104   :  { %2048 = vmatmul.mubr.bf16.gmra.mrb[68].mxu1 %v3511_v3 }
 0x105   :  { %2055 = vmatprep.mubr.bf16.mxu1 %v3518_v4 }
 0x107   :  { %1199 = vmatmul.mubr.bf16.gmra.mrb[52].mxu0 %v3482_v58 }
 0x108   :  { %1208 = vmatprep.mubr.bf16.mxu0 %v3483_v59 }
 0x10c   :  { %2056 = vmatmul.mubr.bf16.gmra.mrb[72].mxu1 %v3520_v5 }
 0x10d   :  { %2063 = vmatprep.mubr.bf16.mxu1 %v3527_v6 }
 0x10f   :  { %1209 = vmatmul.mubr.bf16.gmra.mrb[56].mxu0 %v3485_v61 }
 0x110   :  { %1218 = vmatprep.mubr.bf16.mxu0 %v3491_v62  ;;  %v3586_v62 = vld [vmem:[#allocation4 + $0x1e8] ss:$16 sps:$4 sm:$0xff]  }
 0x114   :  { %2064 = vmatmul.mubr.bf16.gmra.mrb[76].mxu1 %v3529_v7 }
 0x115   :  { %2071 = vmatprep.mubr.bf16.mxu1 %v3536_v8 }
 0x117   :  { %1219 = vmatmul.mubr.bf16.gmra.mrb[60].mxu0 %v3493_v63 }
 0x118   :  { %1261 = vmatprep.mubr.bf16.mxu0 %v3502_v0 }
 0x11c   :  { %2072 = vmatmul.mubr.bf16.gmra.mrb[80].mxu1 %v3538_v13 }
 0x11d   :  { %2079 = vmatprep.mubr.bf16.mxu1 %v3545_v14 }
 0x11f   :  { %1262 = vmatmul.mubr.bf16.vlgmr.msra.gmra.mrb[0].mxu0 %v3500_v1 }
 0x120   :  { %1271 = vmatprep.mubr.bf16.mxu0 %v3509_v2  ;;  %2347 = vmatpush1.bf16.msra.mxu0 %v2341_v12 }
 0x124   :  { %2080 = vmatmul.mubr.bf16.gmra.mrb[84].mxu1 %v3924_v15 }
 0x125   :  { %2087 = vmatprep.mubr.bf16.mxu1 %v3926_v16 }
 0x127   :  { %1272 = vmatmul.mubr.bf16.gmra.mrb[4].mxu0 %v3511_v3  ;;  %v3741_v3 = vmov 0  }
 0x128   :  { %1281 = vmatprep.mubr.bf16.mxu0 %v3518_v4 }
 0x12c   :  { %2088 = vmatmul.mubr.bf16.gmra.mrb[88].mxu1 %v3930_v17 }
 0x12d   :  { %2095 = vmatprep.mubr.bf16.mxu1 %v3932_v18 }
 0x12f   :  { %1282 = vmatmul.mubr.bf16.gmra.mrb[8].mxu0 %v3520_v5 }
 0x130   :  { %1291 = vmatprep.mubr.bf16.mxu0 %v3527_v6 }
 0x134   :  { %2096 = vmatmul.mubr.bf16.gmra.mrb[92].mxu1 %v3936_v19 }
 0x135   :  { %2103 = vmatprep.mubr.bf16.mxu1 %v3938_v20 }
 0x137   :  { %1292 = vmatmul.mubr.bf16.gmra.mrb[12].mxu0 %v3529_v7 }
 0x138   :  { %1301 = vmatprep.mubr.bf16.mxu0 %v3536_v8 }
 0x13c   :  { %2104 = vmatmul.mubr.bf16.gmra.mrb[96].mxu1 %v3942_v21 }
 0x13d   :  { %2111 = vmatprep.mubr.bf16.mxu1 %v3944_v22 }
 0x13f   :  { %1302 = vmatmul.mubr.bf16.gmra.mrb[16].mxu0 %v3538_v13 }
 0x140   :  { %1311 = vmatprep.mubr.bf16.mxu0 %v3545_v14 }
 0x144   :  { %2112 = vmatmul.mubr.bf16.gmra.mrb[100].mxu1 %v3948_v23 }
 0x145   :  { %2119 = vmatprep.mubr.bf16.mxu1 %v3950_v24 }
 0x147   :  { %1312 = vmatmul.mubr.bf16.gmra.mrb[20].mxu0 %v3924_v15 }
 0x148   :  { %1321 = vmatprep.mubr.bf16.mxu0 %v3926_v16 }
 0x14c   :  { %2120 = vmatmul.mubr.bf16.gmra.mrb[104].mxu1 %v3954_v25 }
 0x14d   :  { %2127 = vmatprep.mubr.bf16.mxu1 %v3956_v26 }
 0x14f   :  { %v2947_v28 = vpop.f32.mrb[0].mxu1  ;;  %1322 = vmatmul.mubr.bf16.gmra.mrb[24].mxu0 %v3930_v17 }
 0x150   :  { %v2948_v29 = vpop.f32.mrb[1].mxu1  ;;  %1331 = vmatprep.mubr.bf16.mxu0 %v3932_v18 }
 0x151   :  { %v3994_v31 = vadd.f32 %v2948_v29, %v2947_v28  ;;  %v2950_v32 = vpop.f32.mrb[2].mxu1 }
 0x152   :  { %v2951_v34 = vpop.f32.mrb[3].mxu1 }
 0x153   :  { %v4000_v35 = vadd.f32 %v2951_v34, %v2950_v32 }
 0x154   :  { %2128 = vmatmul.mubr.bf16.gmra.mrb[108].mxu1 %v3992_v30 }
 0x155   :  { %2135 = vmatprep.mubr.bf16.mxu1 %v3997_v33 }
 0x157   :  { %v2953_v36 = vpop.f32.mrb[4].mxu1  ;;  %1332 = vmatmul.mubr.bf16.gmra.mrb[28].mxu0 %v3936_v19 }
 0x158   :  { %v2954_v37 = vpop.f32.mrb[5].mxu1  ;;  %1341 = vmatprep.mubr.bf16.mxu0 %v3938_v20 }
 0x159   :  { %v4006_v39 = vadd.f32 %v2954_v37, %v2953_v36  ;;  %v2956_v40 = vpop.f32.mrb[6].mxu1 }
 0x15a   :  { %v2957_v42 = vpop.f32.mrb[7].mxu1 }
 0x15b   :  { %v4012_v43 = vadd.f32 %v2957_v42, %v2956_v40 }
 0x15c   :  { %2136 = vmatmul.mubr.bf16.gmra.mrb[112].mxu1 %v4004_v38 }
 0x15d   :  { %2143 = vmatprep.mubr.bf16.mxu1 %v4009_v41 }
 0x15f   :  { %v2959_v44 = vpop.f32.mrb[8].mxu1  ;;  %1342 = vmatmul.mubr.bf16.gmra.mrb[32].mxu0 %v3942_v21 }
 0x160   :  { %v2960_v45 = vpop.f32.mrb[9].mxu1  ;;  %1351 = vmatprep.mubr.bf16.mxu0 %v3944_v22 }
 0x161   :  { %v4016_v47 = vadd.f32 %v2960_v45, %v2959_v44  ;;  %v2962_v48 = vpop.f32.mrb[10].mxu1 }
 0x162   :  { %v2963_v50 = vpop.f32.mrb[11].mxu1 }
 0x163   :  { %v4020_v51 = vadd.f32 %v2963_v50, %v2962_v48 }
 0x164   :  { %2144 = vmatmul.mubr.bf16.gmra.mrb[116].mxu1 %v3580_v46 }
 0x165   :  { %2151 = vmatprep.mubr.bf16.mxu1 %v3581_v49 }
 0x167   :  { %v2965_v52 = vpop.f32.mrb[12].mxu1  ;;  %1352 = vmatmul.mubr.bf16.gmra.mrb[36].mxu0 %v3948_v23 }
 0x168   :  { %v2966_v53 = vpop.f32.mrb[13].mxu1  ;;  %1361 = vmatprep.mubr.bf16.mxu0 %v3950_v24 }
 0x169   :  { %v4022_v55 = vadd.f32 %v2966_v53, %v2965_v52  ;;  %v2968_v56 = vpop.f32.mrb[14].mxu1 }
 0x16a   :  { %v2969_v58 = vpop.f32.mrb[15].mxu1 }
 0x16b   :  { %v4026_v59 = vadd.f32 %v2969_v58, %v2968_v56 }
 0x16c   :  { %2152 = vmatmul.mubr.bf16.gmra.mrb[120].mxu1 %v3583_v54 }
 0x16d   :  { %2159 = vmatprep.mubr.bf16.mxu1 %v3584_v57 }
 0x16f   :  { %v2971_v60 = vpop.f32.mrb[16].mxu1  ;;  %1362 = vmatmul.mubr.bf16.gmra.mrb[40].mxu0 %v3954_v25 }
 0x170   :  { %v2972_v61 = vpop.f32.mrb[17].mxu1  ;;  %1371 = vmatprep.mubr.bf16.mxu0 %v3956_v26 }
 0x171   :  { %v4028_v63 = vadd.f32 %v2972_v61, %v2971_v60  ;;  %v2974_v0 = vpop.f32.mrb[18].mxu1 }
 0x172   :  { %v2975_v1 = vpop.f32.mrb[19].mxu1 }
 0x173   :  { %v4032_v2 = vadd.f32 %v2975_v1, %v2974_v0 }
 0x174   :  { %2160 = vmatmul.mubr.bf16.gmra.mrb[124].mxu1 %v3586_v62 }
 0x175   :  { %2438 = vmatprep.mubr.bf16.mxu1 %v3741_v3 }
 0x177   :  { %v2977_v4 = vpop.f32.mrb[20].mxu1  ;;  %1372 = vmatmul.mubr.bf16.gmra.mrb[44].mxu0 %v3992_v30 }
 0x178   :  { %v2978_v5 = vpop.f32.mrb[21].mxu1  ;;  %1381 = vmatprep.mubr.bf16.mxu0 %v3997_v33 }
 0x179   :  { %v4035_v6 = vadd.f32 %v2978_v5, %v2977_v4  ;;  %v2980_v7 = vpop.f32.mrb[22].mxu1 }
 0x17a   :  { %v2981_v8 = vpop.f32.mrb[23].mxu1 }
 0x17b   :  { %v4039_v9 = vadd.f32 %v2981_v8, %v2980_v7 }
 0x17f   :  { %v2983_v10 = vpop.f32.mrb[24].mxu1  ;;  %1382 = vmatmul.mubr.bf16.gmra.mrb[48].mxu0 %v4004_v38 }
 0x180   :  { %v2984_v11 = vpop.f32.mrb[25].mxu1  ;;  %1391 = vmatprep.mubr.bf16.mxu0 %v4009_v41 }
 0x181   :  { %v4041_v12 = vadd.f32 %v2984_v11, %v2983_v10  ;;  %v2986_v13 = vpop.f32.mrb[26].mxu1 }
 0x182   :  { %v2987_v14 = vpop.f32.mrb[27].mxu1 }
 0x183   :  { %v4045_v15 = vadd.f32 %v2987_v14, %v2986_v13 }
 0x187   :  { %v2989_v16 = vpop.f32.mrb[28].mxu1  ;;  %1392 = vmatmul.mubr.bf16.gmra.mrb[52].mxu0 %v3580_v46 }
 0x188   :  { %v2990_v17 = vpop.f32.mrb[29].mxu1  ;;  %1401 = vmatprep.mubr.bf16.mxu0 %v3581_v49 }
 0x189   :  { %v4047_v18 = vadd.f32 %v2990_v17, %v2989_v16  ;;  %v2992_v19 = vpop.f32.mrb[30].mxu1 }
 0x18a   :  { %v2993_v20 = vpop.f32.mrb[31].mxu1 }
 0x18b   :  { %v4051_v21 = vadd.f32 %v2993_v20, %v2992_v19 }
 0x18f   :  { %v2995_v22 = vpop.f32.mrb[32].mxu1  ;;  %1402 = vmatmul.mubr.bf16.gmra.mrb[56].mxu0 %v3583_v54 }
 0x190   :  { %v2996_v23 = vpop.f32.mrb[33].mxu1  ;;  %1411 = vmatprep.mubr.bf16.mxu0 %v3584_v57 }
 0x191   :  { %v4053_v24 = vadd.f32 %v2996_v23, %v2995_v22  ;;  %v2998_v25 = vpop.f32.mrb[34].mxu1 }
 0x192   :  { %v2999_v26 = vpop.f32.mrb[35].mxu1 }
 0x193   :  { %v4055_v27 = vadd.f32 %v2999_v26, %v2998_v25 }
 0x197   :  { %v3001_v28 = vpop.f32.mrb[36].mxu1  ;;  %1412 = vmatmul.mubr.bf16.gmra.mrb[60].mxu0 %v3586_v62 }
 0x198   :  { %v3002_v29 = vpop.f32.mrb[37].mxu1  ;;  %2378 = vmatprep.mubr.bf16.mxu0 %v3741_v3 }
 0x199   :  { %v4057_v30 = vadd.f32 %v3002_v29, %v3001_v28  ;;  %v3004_v32 = vpop.f32.mrb[38].mxu1  ;;  %v1622_v29 = vld [vmem:[#allocation3] sm:$0xff] }
 0x19a   :  { %v3005_v33 = vpop.f32.mrb[39].mxu1 }
 0x19b   :  { %v4059_v34 = vadd.f32 %v3005_v33, %v3004_v32 }
 0x19f   :  { %v3007_v36 = vpop.f32.mrb[40].mxu1 }
 0x1a0   :  { %v3008_v37 = vpop.f32.mrb[41].mxu1 }
 0x1a1   :  { %v4061_v38 = vadd.f32 %v3008_v37, %v3007_v36  ;;  %v3010_v40 = vpop.f32.mrb[42].mxu1  ;;  %v1623_v37 = vld [vmem:[#allocation3 + $0x8] sm:$0xff] }
 0x1a2   :  { %v3011_v41 = vpop.f32.mrb[43].mxu1 }
 0x1a3   :  { %v4064_v42 = vadd.f32 %v3011_v41, %v3010_v40 }
 0x1a7   :  { %v3013_v44 = vpop.f32.mrb[44].mxu1 }
 0x1a8   :  { %v3014_v45 = vpop.f32.mrb[45].mxu1 }
 0x1a9   :  { %v4066_v46 = vadd.f32 %v3014_v45, %v3013_v44  ;;  %v3016_v48 = vpop.f32.mrb[46].mxu1 }
 0x1aa   :  { %v3017_v49 = vpop.f32.mrb[47].mxu1 }
 0x1ab   :  { %v4068_v50 = vadd.f32 %v3017_v49, %v3016_v48 }
 0x1af   :  { %v3019_v52 = vpop.f32.mrb[48].mxu1 }
 0x1b0   :  { %v3020_v53 = vpop.f32.mrb[49].mxu1 }
 0x1b1   :  { %v4070_v54 = vadd.f32 %v3020_v53, %v3019_v52  ;;  %v3022_v56 = vpop.f32.mrb[50].mxu1  ;;  %v1624_v53 = vld [vmem:[#allocation3 + $0x10] sm:$0xff] }
 0x1b2   :  { %v3023_v57 = vpop.f32.mrb[51].mxu1 }
 0x1b3   :  { %v4072_v58 = vadd.f32 %v3023_v57, %v3022_v56 }
 0x1b7   :  { %v3025_v60 = vpop.f32.mrb[52].mxu1 }
 0x1b8   :  { %v3026_v61 = vpop.f32.mrb[53].mxu1 }
 0x1b9   :  { %v4074_v62 = vadd.f32 %v3026_v61, %v3025_v60  ;;  %v3028_v0 = vpop.f32.mrb[54].mxu1 }
 0x1ba   :  { %v3029_v1 = vpop.f32.mrb[55].mxu1 }
 0x1bb   :  { %v4076_v4 = vadd.f32 %v3029_v1, %v3028_v0 }
 0x1bf   :  { %v3031_v5 = vpop.f32.mrb[56].mxu1 }
 0x1c0   :  { %v3032_v7 = vpop.f32.mrb[57].mxu1 }
 0x1c1   :  { %v4078_v8 = vadd.f32 %v3032_v7, %v3031_v5  ;;  %v3034_v10 = vpop.f32.mrb[58].mxu1 }
 0x1c2   :  { %v3035_v11 = vpop.f32.mrb[59].mxu1 }
 0x1c3   :  { %v4080_v13 = vadd.f32 %v3035_v11, %v3034_v10 }
 0x1c7   :  { %v3037_v14 = vpop.f32.mrb[60].mxu1 }
 0x1c8   :  { %v3038_v16 = vpop.f32.mrb[61].mxu1 }
 0x1c9   :  { %v4082_v17 = vadd.f32 %v3038_v16, %v3037_v14  ;;  %v3040_v19 = vpop.f32.mrb[62].mxu1 }
 0x1ca   :  { %v3041_v20 = vpop.f32.mrb[63].mxu1 }
 0x1cb   :  { %v4084_v22 = vadd.f32 %v3041_v20, %v3040_v19  ;;  %v1626_v19 = vld [vmem:[#allocation3 + $0x20] sm:$0xff] }
 0x1cf   :  { %v3059_v23 = vpop.f32.mrb[64].mxu1 }
 0x1d0   :  { %v3060_v25 = vpop.f32.mrb[65].mxu1 }
 0x1d1   :  { %v3061_v26 = vadd.f32 %v3060_v25, %v3059_v23  ;;  %v3062_v28 = vpop.f32.mrb[66].mxu1 }
 0x1d2   :  { %v3063_v32 = vpop.f32.mrb[67].mxu1 }
 0x1d3   :  { %v2042_v33 = vadd.f32 %v3061_v26, %v3994_v31  ;;  %v3064_v36 = vadd.f32 %v3063_v32, %v3062_v28  ;;  %v1625_v31 = vld [vmem:[#allocation3 + $0x18] sm:$0xff] }
 0x1d5   :  { %v2168_v40 = vadd.f32 %v2042_v33, %v1622_v29  ;;  %v2045_v41 = vadd.f32 %v3064_v36, %v4000_v35 }
 0x1d7   :  { %2201 = vst.msk [vmem:[#allocation3] sm:$0xff] %vm171_vm1, %v2168_v40  ;;  %v2169_v44 = vadd.f32 %v2045_v41, %v1623_v37  ;;  %v3065_v45 = vpop.f32.mrb[68].mxu1  ;;  %v1628_v41 = vld [vmem:[#allocation3 + $0x30] sm:$0xff] }
 0x1d8   :  { %v3066_v48 = vpop.f32.mrb[69].mxu1 }
 0x1d9   :  { %2202 = vst.msk [vmem:[#allocation3 + $0x8] sm:$0xff] %vm171_vm1, %v2169_v44  ;;  %v3067_v49 = vadd.f32 %v3066_v48, %v3065_v45  ;;  %v3068_v52 = vpop.f32.mrb[70].mxu1 }
 0x1da   :  { %v3069_v56 = vpop.f32.mrb[71].mxu1 }
 0x1db   :  { %v2050_v57 = vadd.f32 %v3067_v49, %v4006_v39  ;;  %v3070_v60 = vadd.f32 %v3069_v56, %v3068_v52 }
 0x1dd   :  { %v2170_v61 = vadd.f32 %v2050_v57, %v1624_v53  ;;  %v2053_v0 = vadd.f32 %v3070_v60, %v4012_v43  ;;  %v1627_v43 = vld [vmem:[#allocation3 + $0x28] sm:$0xff] }
 0x1de   :  { %v2236_v7 = vld [vmem:[#allocation3] sm:$0xff] }
 0x1df   :  { %2203 = vst.msk [vmem:[#allocation3 + $0x10] sm:$0xff] %vm171_vm1, %v2170_v61  ;;  %v2171_v35 = vadd.f32 %v2053_v0, %v1625_v31  ;;  %v3071_v1 = vpop.f32.mrb[72].mxu1 }
 0x1e0   :  { %v3072_v5 = vpop.f32.mrb[73].mxu1  ;;  %v2237_v10 = vld [vmem:[#allocation3 + $0x8] sm:$0xff] }
 0x1e1   :  { %2204 = vst.msk [vmem:[#allocation3 + $0x18] sm:$0xff] %vm171_vm1, %v2171_v35  ;;  %v3073_v11 = vadd.f32 %v3072_v5, %v3071_v1  ;;  %v3074_v14 = vpop.f32.mrb[74].mxu1  ;;  %v2268_v16 = vpack.c.bf16 %v2237_v10, %v2236_v7  ;;  %v1630_v35 = vld [vmem:[#allocation3 + $0x40] sm:$0xff] }
 0x1e2   :  { %v3075_v20 = vpop.f32.mrb[75].mxu1 }
 0x1e3   :  { %v2058_v39 = vadd.f32 %v3073_v11, %v4016_v47  ;;  %v3076_v23 = vadd.f32 %v3075_v20, %v3074_v14  ;;  %2915 = vmatmul.mubr.msk.bf16.vlgmr.msra.gmra.mrb[0].mxu0 %vm171_vm1, %v2268_v16 }
 0x1e4   :  { %2388 = vmatprep.mubr.bf16.mxu0 %v3741_v3 }
 0x1e5   :  { %v2172_v25 = vadd.f32 %v2058_v39, %v1626_v19  ;;  %v2061_v26 = vadd.f32 %v3076_v23, %v4020_v51  ;;  %v1629_v51 = vld [vmem:[#allocation3 + $0x38] sm:$0xff] }
 0x1e6   :  { %v2238_v33 = vld [vmem:[#allocation3 + $0x10] sm:$0xff] }
 0x1e7   :  { %2205 = vst.msk [vmem:[#allocation3 + $0x20] sm:$0xff] %vm171_vm1, %v2172_v25  ;;  %v2173_v28 = vadd.f32 %v2061_v26, %v1627_v43  ;;  %v3077_v29 = vpop.f32.mrb[76].mxu1  ;;  %v1632_v25 = vld [vmem:[#allocation3 + $0x50] sm:$0xff] }
 0x1e8   :  { %v3078_v32 = vpop.f32.mrb[77].mxu1  ;;  %v2239_v36 = vld [vmem:[#allocation3 + $0x18] sm:$0xff] }
 0x1e9   :  { %2206 = vst.msk [vmem:[#allocation3 + $0x28] sm:$0xff] %vm171_vm1, %v2173_v28  ;;  %v3079_v37 = vadd.f32 %v3078_v32, %v3077_v29  ;;  %v3080_v47 = vpop.f32.mrb[78].mxu1  ;;  %v2269_v40 = vpack.c.bf16 %v2239_v36, %v2238_v33 }
 0x1ea   :  { %v3081_v44 = vpop.f32.mrb[79].mxu1 }
 0x1eb   :  { %v2066_v45 = vadd.f32 %v3079_v37, %v4022_v55  ;;  %v3082_v48 = vadd.f32 %v3081_v44, %v3080_v47  ;;  %2916 = vmatmul.mubr.msk.bf16.gmra.mrb[4].mxu0 %vm171_vm1, %v2269_v40 }
 0x1ec   :  { %2398 = vmatprep.mubr.bf16.mxu0 %v3741_v3 }
 0x1ed   :  { %v2174_v49 = vadd.f32 %v2066_v45, %v1628_v41  ;;  %v2069_v52 = vadd.f32 %v3082_v48, %v4026_v59  ;;  %v1631_v59 = vld [vmem:[#allocation3 + $0x48] sm:$0xff]  ;;  %v1634_v48 = vld [vmem:[#allocation3 + $0x60] sm:$0xff] }
 0x1ee   :  { %v2240_v60 = vld [vmem:[#allocation3 + $0x20] sm:$0xff] }
 0x1ef   :  { %2207 = vst.msk [vmem:[#allocation3 + $0x30] sm:$0xff] %vm171_vm1, %v2174_v49  ;;  %v2175_v53 = vadd.f32 %v2069_v52, %v1629_v51  ;;  %v3083_v56 = vpop.f32.mrb[80].mxu1 }
 0x1f0   :  { %v3084_v57 = vpop.f32.mrb[81].mxu1  ;;  %v2241_v31 = vld [vmem:[#allocation3 + $0x28] sm:$0xff] }
 0x1f1   :  { %2208 = vst.msk [vmem:[#allocation3 + $0x38] sm:$0xff] %vm171_vm1, %v2175_v53  ;;  %v3085_v61 = vadd.f32 %v3084_v57, %v3083_v56  ;;  %v3086_v55 = vpop.f32.mrb[82].mxu1  ;;  %v2270_v0 = vpack.c.bf16 %v2241_v31, %v2240_v60 }
 0x1f2   :  { %v3087_v1 = vpop.f32.mrb[83].mxu1 }
 0x1f3   :  { %v2074_v5 = vadd.f32 %v3085_v61, %v4028_v63  ;;  %v3088_v7 = vadd.f32 %v3087_v1, %v3086_v55  ;;  %2917 = vmatmul.mubr.msk.bf16.gmra.mrb[8].mxu0 %vm171_vm1, %v2270_v0  ;;  %v1636_v1 = vld [vmem:[#allocation3 + $0x70] sm:$0xff] }
 0x1f4   :  { %2408 = vmatprep.mubr.bf16.mxu0 %v3741_v3 }
 0x1f5   :  { %v2176_v10 = vadd.f32 %v2074_v5, %v1630_v35  ;;  %v2077_v11 = vadd.f32 %v3088_v7, %v4032_v2  ;;  %v1633_v2 = vld [vmem:[#allocation3 + $0x58] sm:$0xff] }
 0x1f6   :  { %v2242_v20 = vld [vmem:[#allocation3 + $0x30] sm:$0xff] }
 0x1f7   :  { %2209 = vst.msk [vmem:[#allocation3 + $0x40] sm:$0xff] %vm171_vm1, %v2176_v10  ;;  %v2177_v14 = vadd.f32 %v2077_v11, %v1631_v59  ;;  %v3089_v16 = vpop.f32.mrb[84].mxu1 }
 0x1f8   :  { %v3090_v19 = vpop.f32.mrb[85].mxu1  ;;  %v2243_v39 = vld [vmem:[#allocation3 + $0x38] sm:$0xff] }
 0x1f9   :  { %2210 = vst.msk [vmem:[#allocation3 + $0x48] sm:$0xff] %vm171_vm1, %v2177_v14  ;;  %v3091_v23 = vadd.f32 %v3090_v19, %v3089_v16  ;;  %v3092_v63 = vpop.f32.mrb[86].mxu1  ;;  %v2271_v43 = vpack.c.bf16 %v2243_v39, %v2242_v20 }
 0x1fa   :  { %v3093_v26 = vpop.f32.mrb[87].mxu1 }
 0x1fb   :  { %v2082_v28 = vadd.f32 %v3091_v23, %v4035_v6  ;;  %v3094_v29 = vadd.f32 %v3093_v26, %v3092_v63  ;;  %2918 = vmatmul.mubr.msk.bf16.gmra.mrb[12].mxu0 %vm171_vm1, %v2271_v43 }
 0x1fc   :  { %2418 = vmatprep.mubr.bf16.mxu0 %v3741_v3 }
 0x1fd   :  { %v2178_v32 = vadd.f32 %v2082_v28, %v1632_v25  ;;  %v2085_v33 = vadd.f32 %v3094_v29, %v4039_v9  ;;  %v1635_v9 = vld [vmem:[#allocation3 + $0x68] sm:$0xff] }
 0x1fe   :  { %v2244_v40 = vld [vmem:[#allocation3 + $0x40] sm:$0xff] }
 0x1ff   :  { %2211 = vst.msk [vmem:[#allocation3 + $0x50] sm:$0xff] %vm171_vm1, %v2178_v32  ;;  %v2179_v36 = vadd.f32 %v2085_v33, %v1633_v2  ;;  %v3095_v37 = vpop.f32.mrb[88].mxu1 }
 0x200   :  { %v3096_v47 = vpop.f32.mrb[89].mxu1  ;;  %v2245_v41 = vld [vmem:[#allocation3 + $0x48] sm:$0xff] }
 0x201   :  { %2212 = vst.msk [vmem:[#allocation3 + $0x58] sm:$0xff] %vm171_vm1, %v2179_v36  ;;  %v3097_v44 = vadd.f32 %v3096_v47, %v3095_v37  ;;  %v3098_v6 = vpop.f32.mrb[90].mxu1  ;;  %v2272_v45 = vpack.c.bf16 %v2245_v41, %v2244_v40 }
 0x202   :  { %v3099_v51 = vpop.f32.mrb[91].mxu1 }
 0x203   :  { %v2090_v49 = vadd.f32 %v3097_v44, %v4041_v12  ;;  %v3100_v52 = vadd.f32 %v3099_v51, %v3098_v6  ;;  %2919 = vmatmul.mubr.msk.bf16.gmra.mrb[16].mxu0 %vm171_vm1, %v2272_v45  ;;  %v1640_v44 = vld [vmem:[#allocation3 + $0x90] sm:$0xff] }
 0x204   :  { %2428 = vmatprep.mubr.bf16.mxu0 %v3741_v3 }
 0x205   :  { %v2180_v53 = vadd.f32 %v2090_v49, %v1634_v48  ;;  %v2093_v56 = vadd.f32 %v3100_v52, %v4045_v15  ;;  %v1637_v15 = vld [vmem:[#allocation3 + $0x78] sm:$0xff] }
 0x206   :  { %v2246_v61 = vld [vmem:[#allocation3 + $0x50] sm:$0xff] }
 0x207   :  { %2213 = vst.msk [vmem:[#allocation3 + $0x60] sm:$0xff] %vm171_vm1, %v2180_v53  ;;  %v2181_v57 = vadd.f32 %v2093_v56, %v1635_v9  ;;  %v3101_v60 = vpop.f32.mrb[92].mxu1 }
 0x208   :  { %v3102_v31 = vpop.f32.mrb[93].mxu1  ;;  %v2247_v55 = vld [vmem:[#allocation3 + $0x58] sm:$0xff] }
 0x209   :  { %2214 = vst.msk [vmem:[#allocation3 + $0x68] sm:$0xff] %vm171_vm1, %v2181_v57  ;;  %v3103_v0 = vadd.f32 %v3102_v31, %v3101_v60  ;;  %v3104_v12 = vpop.f32.mrb[94].mxu1  ;;  %v2273_v35 = vpack.c.bf16 %v2247_v55, %v2246_v61  ;;  %v1642_v61 = vld [vmem:[#allocation3 + $0xa0] sm:$0xff] }
 0x20a   :  { %v3105_v5 = vpop.f32.mrb[95].mxu1 }
 0x20b   :  { %v2098_v7 = vadd.f32 %v3103_v0, %v4047_v18  ;;  %v3106_v59 = vadd.f32 %v3105_v5, %v3104_v12  ;;  %2920 = vmatmul.mubr.msk.bf16.gmra.mrb[20].mxu0 %vm171_vm1, %v2273_v35  ;;  %v1638_v18 = vld [vmem:[#allocation3 + $0x80] sm:$0xff] }
 0x20d   :  { %v2182_v10 = vadd.f32 %v2098_v7, %v1636_v1  ;;  %v2101_v11 = vadd.f32 %v3106_v59, %v4051_v21  ;;  %v1639_v21 = vld [vmem:[#allocation3 + $0x88] sm:$0xff] }
 0x20e   :  { %v2248_v20 = vld [vmem:[#allocation3 + $0x60] sm:$0xff] }
 0x20f   :  { %2215 = vst.msk [vmem:[#allocation3 + $0x70] sm:$0xff] %vm171_vm1, %v2182_v10  ;;  %v2183_v14 = vadd.f32 %v2101_v11, %v1637_v15  ;;  %v3107_v16 = vpop.f32.mrb[96].mxu1 }
 0x210   :  { %v3108_v19 = vpop.f32.mrb[97].mxu1  ;;  %v2249_v39 = vld [vmem:[#allocation3 + $0x68] sm:$0xff] }
 0x211   :  { %2216 = vst.msk [vmem:[#allocation3 + $0x78] sm:$0xff] %vm171_vm1, %v2183_v14  ;;  %v3109_v23 = vadd.f32 %v3108_v19, %v3107_v16  ;;  %v3110_v63 = vpop.f32.mrb[98].mxu1  ;;  %v2274_v43 = vpack.c.bf16 %v2249_v39, %v2248_v20  ;;  %v1644_v16 = vld [vmem:[#allocation3 + $0xb0] sm:$0xff] }
 0x212   :  { %v3111_v25 = vpop.f32.mrb[99].mxu1 }
 0x213   :  { %v2106_v26 = vadd.f32 %v3109_v23, %v4053_v24  ;;  %v3112_v28 = vadd.f32 %v3111_v25, %v3110_v63  ;;  %2921 = vmatmul.mubr.msk.bf16.vlgmr.msra.gmra.mrb[128].mxu1 %vm171_vm1, %v2274_v43 }
 0x214   :  { %2448 = vmatprep.mubr.bf16.mxu1 %v3741_v3 }
 0x215   :  { %v2184_v29 = vadd.f32 %v2106_v26, %v1638_v18  ;;  %v2109_v2 = vadd.f32 %v3112_v28, %v4055_v27  ;;  %v1641_v27 = vld [vmem:[#allocation3 + $0x98] sm:$0xff] }
 0x216   :  { %v2250_v37 = vld [vmem:[#allocation3 + $0x70] sm:$0xff] }
 0x217   :  { %2217 = vst.msk [vmem:[#allocation3 + $0x80] sm:$0xff] %vm171_vm1, %v2184_v29  ;;  %v2185_v32 = vadd.f32 %v2109_v2, %v1639_v21  ;;  %v3113_v33 = vpop.f32.mrb[100].mxu1 }
 0x218   :  { %v3114_v36 = vpop.f32.mrb[101].mxu1  ;;  %v2251_v47 = vld [vmem:[#allocation3 + $0x78] sm:$0xff] }
 0x219   :  { %2218 = vst.msk [vmem:[#allocation3 + $0x88] sm:$0xff] %vm171_vm1, %v2185_v32  ;;  %v3115_v40 = vadd.f32 %v3114_v36, %v3113_v33  ;;  %v3116_v24 = vpop.f32.mrb[102].mxu1  ;;  %v2275_v41 = vpack.c.bf16 %v2251_v47, %v2250_v37  ;;  %v1646_v37 = vld [vmem:[#allocation3 + $0xc0] sm:$0xff] }
 0x21a   :  { %v3117_v6 = vpop.f32.mrb[103].mxu1 }
 0x21b   :  { %v2114_v45 = vadd.f32 %v3115_v40, %v4057_v30  ;;  %v3118_v48 = vadd.f32 %v3117_v6, %v3116_v24  ;;  %2922 = vmatmul.mubr.msk.bf16.gmra.mrb[132].mxu1 %vm171_vm1, %v2275_v41  ;;  %v1647_v24 = vld [vmem:[#allocation3 + $0xc8] sm:$0xff] }
 0x21c   :  { %2458 = vmatprep.mubr.bf16.mxu1 %v3741_v3 }
 0x21d   :  { %v2186_v51 = vadd.f32 %v2114_v45, %v1640_v44  ;;  %v2117_v49 = vadd.f32 %v3118_v48, %v4059_v34  ;;  %v1643_v34 = vld [vmem:[#allocation3 + $0xa8] sm:$0xff] }
 0x21e   :  { %v2252_v56 = vld [vmem:[#allocation3 + $0x80] sm:$0xff] }
 0x21f   :  { %2219 = vst.msk [vmem:[#allocation3 + $0x90] sm:$0xff] %vm171_vm1, %v2186_v51  ;;  %v2187_v52 = vadd.f32 %v2117_v49, %v1641_v27  ;;  %v3119_v9 = vpop.f32.mrb[104].mxu1 }
 0x220   :  { %v3120_v53 = vpop.f32.mrb[105].mxu1  ;;  %v2253_v57 = vld [vmem:[#allocation3 + $0x88] sm:$0xff] }
 0x221   :  { %2220 = vst.msk [vmem:[#allocation3 + $0x98] sm:$0xff] %vm171_vm1, %v2187_v52  ;;  %v3121_v60 = vadd.f32 %v3120_v53, %v3119_v9  ;;  %v3122_v30 = vpop.f32.mrb[106].mxu1  ;;  %v2276_v31 = vpack.c.bf16 %v2253_v57, %v2252_v56 }
 0x222   :  { %v3123_v55 = vpop.f32.mrb[107].mxu1  ;;  %v4150_v23 = vpop.f32.mrb[24].mxu0 }
 0x223   :  { %v2122_v0 = vadd.f32 %v3121_v60, %v4061_v38  ;;  %v3124_v12 = vadd.f32 %v3123_v55, %v3122_v30  ;;  %2923 = vmatmul.mubr.msk.bf16.gmra.mrb[136].mxu1 %vm171_vm1, %v2276_v31  ;;  %v4153_v18 = vpop.f32.mrb[25].mxu0  ;;  %v1648_v60 = vld [vmem:[#allocation3 + $0xd0] sm:$0xff] }
 0x224   :  { %2468 = vmatprep.mubr.bf16.mxu1 %v3741_v3  ;;  %v4155_v25 = vpop.f32.mrb[26].mxu0 }
 0x225   :  { %v2188_v35 = vadd.f32 %v2122_v0, %v1642_v61  ;;  %v2125_v1 = vadd.f32 %v3124_v12, %v4064_v42  ;;  %v1645_v42 = vld [vmem:[#allocation3 + $0xb8] sm:$0xff] }
 0x226   :  { %v2254_v15 = vld [vmem:[#allocation3 + $0x90] sm:$0xff]  ;;  %v1649_v61 = vld [vmem:[#allocation3 + $0xd8] sm:$0xff] }
 0x227   :  { %2221 = vst.msk [vmem:[#allocation3 + $0xa0] sm:$0xff] %vm171_vm1, %v2188_v35  ;;  %v2189_v5 = vadd.f32 %v2125_v1, %v1643_v34  ;;  %v3125_v7 = vpop.f32.mrb[108].mxu1 }
 0x228   :  { %v3126_v59 = vpop.f32.mrb[109].mxu1  ;;  %v2255_v10 = vld [vmem:[#allocation3 + $0x98] sm:$0xff] }
 0x229   :  { %2222 = vst.msk [vmem:[#allocation3 + $0xa8] sm:$0xff] %vm171_vm1, %v2189_v5  ;;  %v3127_v11 = vadd.f32 %v3126_v59, %v3125_v7  ;;  %v3128_v38 = vpop.f32.mrb[110].mxu1  ;;  %v2277_v14 = vpack.c.bf16 %v2255_v10, %v2254_v15 }
 0x22a   :  { %v3129_v19 = vpop.f32.mrb[111].mxu1 }
 0x22b   :  { %v2130_v20 = vadd.f32 %v3127_v11, %v4066_v46  ;;  %v3130_v39 = vadd.f32 %v3129_v19, %v3128_v38  ;;  %2924 = vmatmul.mubr.msk.bf16.gmra.mrb[140].mxu1 %vm171_vm1, %v2277_v14  ;;  %v4158_v46 = vpop.f32.mrb[27].mxu0  ;;  %v1650_v14 = vld [vmem:[#allocation3 + $0xe0] sm:$0xff] }
 0x22c   :  { %2478 = vmatprep.mubr.bf16.mxu1 %v3741_v3  ;;  %v4164_v41 = vpop.f32.mrb[28].mxu0 }
 0x22d   :  { %v2190_v63 = vadd.f32 %v2130_v20, %v1644_v16  ;;  %v2133_v43 = vadd.f32 %v3130_v39, %v4068_v50  ;;  %v4167_v45 = vpop.f32.mrb[29].mxu0  ;;  %v1651_v20 = vld [vmem:[#allocation3 + $0xe8] sm:$0xff] }
 0x22e   :  { %v2256_v29 = vld [vmem:[#allocation3 + $0xa0] sm:$0xff]  ;;  %v4169_v48 = vpop.f32.mrb[30].mxu0 }
 0x22f   :  { %2223 = vst.msk [vmem:[#allocation3 + $0xb0] sm:$0xff] %vm171_vm1, %v2190_v63  ;;  %v2191_v26 = vadd.f32 %v2133_v43, %v1645_v42  ;;  %v3131_v28 = vpop.f32.mrb[112].mxu1 }
 0x230   :  { %v3132_v21 = vpop.f32.mrb[113].mxu1  ;;  %v2257_v2 = vld [vmem:[#allocation3 + $0xa8] sm:$0xff] }
 0x231   :  { %2224 = vst.msk [vmem:[#allocation3 + $0xb8] sm:$0xff] %vm171_vm1, %v2191_v26  ;;  %v3133_v32 = vadd.f32 %v3132_v21, %v3131_v28  ;;  %v3134_v33 = vpop.f32.mrb[114].mxu1  ;;  %v2278_v36 = vpack.c.bf16 %v2257_v2, %v2256_v29 }
 0x232   :  { %v3135_v50 = vpop.f32.mrb[115].mxu1 }
 0x233   :  { %v2138_v47 = vadd.f32 %v3133_v32, %v4070_v54  ;;  %v3136_v40 = vadd.f32 %v3135_v50, %v3134_v33  ;;  %2925 = vmatmul.mubr.msk.bf16.gmra.mrb[144].mxu1 %vm171_vm1, %v2278_v36  ;;  %v4172_v54 = vpop.f32.mrb[31].mxu0  ;;  %v1652_v50 = vld [vmem:[#allocation3 + $0xf0] sm:$0xff] }
 0x234   :  { %2488 = vmatprep.mubr.bf16.mxu1 %v3741_v3  ;;  %v4178_v55 = vpop.f32.mrb[32].mxu0 }
 0x235   :  { %v2192_v44 = vadd.f32 %v2138_v47, %v1646_v37  ;;  %v2141_v6 = vadd.f32 %v3136_v40, %v4072_v58  ;;  %v4181_v34 = vpop.f32.mrb[33].mxu0 }
 0x236   :  { %v2258_v52 = vld [vmem:[#allocation3 + $0xb0] sm:$0xff]  ;;  %v4183_v35 = vpop.f32.mrb[34].mxu0 }
 0x237   :  { %2225 = vst.msk [vmem:[#allocation3 + $0xc0] sm:$0xff] %vm171_vm1, %v2192_v44  ;;  %v2193_v27 = vadd.f32 %v2141_v6, %v1647_v24  ;;  %v3137_v51 = vpop.f32.mrb[116].mxu1  ;;  %v1653_v24 = vld [vmem:[#allocation3 + $0xf8] sm:$0xff] }
 0x238   :  { %v3138_v49 = vpop.f32.mrb[117].mxu1  ;;  %v2259_v9 = vld [vmem:[#allocation3 + $0xb8] sm:$0xff] }
 0x239   :  { %2226 = vst.msk [vmem:[#allocation3 + $0xc8] sm:$0xff] %vm171_vm1, %v2193_v27  ;;  %v3139_v53 = vadd.f32 %v3138_v49, %v3137_v51  ;;  %v3140_v56 = vpop.f32.mrb[118].mxu1  ;;  %v2279_v57 = vpack.c.bf16 %v2259_v9, %v2258_v52 }
 0x23a   :  { %v3141_v58 = vpop.f32.mrb[119].mxu1 }
 0x23b   :  { %v2146_v30 = vadd.f32 %v3139_v53, %v4074_v62  ;;  %v3142_v31 = vadd.f32 %v3141_v58, %v3140_v56  ;;  %2926 = vmatmul.mubr.msk.bf16.gmra.mrb[148].mxu1 %vm171_vm1, %v2279_v57  ;;  %v4186_v62 = vpop.f32.mrb[35].mxu0 }
 0x23c   :  { %2498 = vmatprep.mubr.bf16.mxu1 %v3741_v3  ;;  %v4192_v39 = vpop.f32.mrb[36].mxu0 }
 0x23d   :  { %v2194_v0 = vadd.f32 %v2146_v30, %v1648_v60  ;;  %v2149_v12 = vadd.f32 %v3142_v31, %v4076_v4  ;;  %v4195_v43 = vpop.f32.mrb[37].mxu0 }
 0x23e   :  { %v2260_v59 = vld [vmem:[#allocation3 + $0xc0] sm:$0xff]  ;;  %v4197_v26 = vpop.f32.mrb[38].mxu0 }
 0x23f   :  { %2227 = vst.msk [vmem:[#allocation3 + $0xd0] sm:$0xff] %vm171_vm1, %v2194_v0  ;;  %v2195_v1 = vadd.f32 %v2149_v12, %v1649_v61  ;;  %v3143_v5 = vpop.f32.mrb[120].mxu1 }
 0x240   :  { %v3144_v7 = vpop.f32.mrb[121].mxu1  ;;  %v2261_v15 = vld [vmem:[#allocation3 + $0xc8] sm:$0xff] }
 0x241   :  { %2228 = vst.msk [vmem:[#allocation3 + $0xd8] sm:$0xff] %vm171_vm1, %v2195_v1  ;;  %v3145_v10 = vadd.f32 %v3144_v7, %v3143_v5  ;;  %v3146_v11 = vpop.f32.mrb[122].mxu1  ;;  %v2280_v38 = vpack.c.bf16 %v2261_v15, %v2260_v59 }
 0x242   :  { %v3147_v4 = vpop.f32.mrb[123].mxu1 }
 0x243   :  { %v2154_v16 = vadd.f32 %v3145_v10, %v4078_v8  ;;  %v3148_v19 = vadd.f32 %v3147_v4, %v3146_v11  ;;  %2927 = vmatmul.mubr.msk.bf16.gmra.mrb[152].mxu1 %vm171_vm1, %v2280_v38  ;;  %v4200_v8 = vpop.f32.mrb[39].mxu0 }
 0x244   :  { %2508 = vmatprep.mubr.bf16.mxu1 %v3741_v3  ;;  %v4206_v44 = vpop.f32.mrb[40].mxu0 }
 0x245   :  { %v2196_v42 = vadd.f32 %v2154_v16, %v1650_v14  ;;  %v2157_v63 = vadd.f32 %v3148_v19, %v4080_v13  ;;  %v4209_v51 = vpop.f32.mrb[41].mxu0 }
 0x246   :  { %v2262_v2 = vld [vmem:[#allocation3 + $0xd0] sm:$0xff]  ;;  %v4211_v49 = vpop.f32.mrb[42].mxu0 }
 0x247   :  { %2229 = vst.msk [vmem:[#allocation3 + $0xe0] sm:$0xff] %vm171_vm1, %v2196_v42  ;;  %v2197_v28 = vadd.f32 %v2157_v63, %v1651_v20  ;;  %v3149_v21 = vpop.f32.mrb[124].mxu1  ;;  %v4214_v9 = vpop.f32.mrb[43].mxu0  ;;  %v92_v42 = vlaneseq }
 0x248   :  { %v3150_v29 = vpop.f32.mrb[125].mxu1  ;;  %v2263_v32 = vld [vmem:[#allocation3 + $0xd8] sm:$0xff] }
 0x249   :  { %2230 = vst.msk [vmem:[#allocation3 + $0xe8] sm:$0xff] %vm171_vm1, %v2197_v28  ;;  %v3151_v33 = vadd.f32 %v3150_v29, %v3149_v21  ;;  %v3152_v36 = vpop.f32.mrb[126].mxu1  ;;  %v2281_v37 = vpack.c.bf16 %v2263_v32, %v2262_v2  ;;  %v93_v63 = vshrl.u32 %v92_v42, 7  ;;  %v90_v21 = vld [vmem:[#allocation9] sm:$0x3] }
 0x24a   :  { %v3153_v13 = vpop.f32.mrb[127].mxu1  ;;  %v4219_v57 = vpop.f32.mrb[44].mxu0 }
 0x24b   :  { %v2162_v47 = vadd.f32 %v3151_v33, %v4082_v17  ;;  %v3154_v40 = vadd.f32 %v3153_v13, %v3152_v36  ;;  %2928 = vmatmul.mubr.msk.bf16.gmra.mrb[156].mxu1 %vm171_vm1, %v2281_v37  ;;  %v94_v28 = vsub.s32 0, %v93_v63  ;;  %v98_v29 = vsub.s32 1, %v93_v63 }
 0x24c   :  { %2518 = vmatprep.mubr.bf16.mxu1 %v3741_v3 }
 0x24d   :  { %v2198_v6 = vadd.f32 %v2162_v47, %v1652_v50  ;;  %v2165_v27 = vadd.f32 %v3154_v40, %v4084_v22  ;;  %v4221_v22 = vpop.f32.mrb[45].mxu0  ;;  %v4260_v2 = vrot.slane %v90_v21, %v94_v28  ;;  %v4262_v32 = vrot.slane %v90_v21, %v98_v29 }
 0x24e   :  { %v2264_v17 = vld [vmem:[#allocation3 + $0xe0] sm:$0xff]  ;;  %v4223_v60 = vpop.f32.mrb[46].mxu0 }
 0x24f   :  { %2231 = vst.msk [vmem:[#allocation3 + $0xf0] sm:$0xff] %vm171_vm1, %v2198_v6  ;;  %v2199_v52 = vadd.f32 %v2165_v27, %v1653_v24  ;;  %v4225_v58 = vpop.f32.mrb[47].mxu0 }
 0x250   :  { %v2265_v53 = vld [vmem:[#allocation3 + $0xe8] sm:$0xff] }
 0x251   :  { %2232 = vst.msk [vmem:[#allocation3 + $0xf8] sm:$0xff] %vm171_vm1, %v2199_v52  ;;  %v2282_v56 = vpack.c.bf16 %v2265_v53, %v2264_v17 }
 0x252   :  { %v4228_v0 = vpop.f32.mrb[48].mxu0 }
 0x253   :  { %2929 = vmatmul.mubr.msk.bf16.gmra.mrb[160].mxu1 %vm171_vm1, %v2282_v56  ;;  %v4230_v12 = vpop.f32.mrb[49].mxu0 }
 0x254   :  { %2528 = vmatprep.mubr.bf16.mxu1 %v3741_v3  ;;  %v4232_v1 = vpop.f32.mrb[50].mxu0 }
 0x255   :  { %v4234_v3 = vpop.f32.mrb[51].mxu0 }
 0x256   :  { %v2266_v30 = vld [vmem:[#allocation3 + $0xf0] sm:$0xff] }
 0x258   :  { %v2267_v31 = vld [vmem:[#allocation3 + $0xf8] sm:$0xff] }
 0x259   :  { %v2283_v61 = vpack.c.bf16 %v2267_v31, %v2266_v30 }
 0x25a   :  { %v4236_v5 = vpop.f32.mrb[52].mxu0 }
 0x25b   :  { %2930 = vmatmul.mubr.msk.bf16.gmra.mrb[164].mxu1 %vm171_vm1, %v2283_v61  ;;  %v4238_v7 = vpop.f32.mrb[53].mxu0 }
 0x25c   :  { %v4240_v59 = vpop.f32.mrb[54].mxu0 }
 0x25d   :  { %v4242_v15 = vpop.f32.mrb[55].mxu0 }
 0x262   :  { %v4244_v10 = vpop.f32.mrb[56].mxu0 }
 0x263   :  { %v4246_v11 = vpop.f32.mrb[57].mxu0 }
 0x264   :  { %v4248_v38 = vpop.f32.mrb[58].mxu0 }
 0x265   :  { %v4250_v14 = vpop.f32.mrb[59].mxu0 }
 0x26a   :  { %v4252_v4 = vpop.f32.mrb[60].mxu0 }
 0x26b   :  { %v4254_v16 = vpop.f32.mrb[61].mxu0 }
 0x26c   :  { %v4256_v19 = vpop.f32.mrb[62].mxu0 }
 0x26d   :  { %v4258_v20 = vpop.f32.mrb[63].mxu0 }
 0x2b6   :  { %v2380_v33 = vpop.f32.mrb[0].mxu0 }
 0x2b7   :  { %v3157_v36 = vadd.f32 %v2380_v33, %v4260_v2  ;;  %v2382_v37 = vpop.f32.mrb[1].mxu0 }
 0x2b8   :  { %v3158_v50 = vadd.f32 %v2382_v37, %v4262_v32  ;;  %v2384_v13 = vpop.f32.mrb[2].mxu0 }
 0x2b9   :  { %2667 = vst [vmem:[#allocation13] sm:$0xff] %v3157_v36  ;;  %v3159_v47 = vadd.f32 %v2384_v13, %v4260_v2  ;;  %v2386_v40 = vpop.f32.mrb[3].mxu0 }
 0x2ba   :  { %2668 = vst [vmem:[#allocation13 + $0x8] sm:$0xff] %v3158_v50  ;;  %v3160_v24 = vadd.f32 %v2386_v40, %v4262_v32 }
 0x2bb   :  { %2669 = vst [vmem:[#allocation13 + $0x10] sm:$0xff] %v3159_v47 }
 0x2bc   :  { %2670 = vst [vmem:[#allocation13 + $0x18] sm:$0xff] %v3160_v24 }
 0x2be   :  { %v2390_v6 = vpop.f32.mrb[4].mxu0 }
 0x2bf   :  { %v3161_v27 = vadd.f32 %v2390_v6, %v4260_v2  ;;  %v2392_v52 = vpop.f32.mrb[5].mxu0 }
 0x2c0   :  { %v3162_v17 = vadd.f32 %v2392_v52, %v4262_v32  ;;  %v2394_v53 = vpop.f32.mrb[6].mxu0 }
 0x2c1   :  { %2671 = vst [vmem:[#allocation13 + $0x20] sm:$0xff] %v3161_v27  ;;  %v3163_v56 = vadd.f32 %v2394_v53, %v4260_v2  ;;  %v2396_v30 = vpop.f32.mrb[7].mxu0 }
 0x2c2   :  { %2672 = vst [vmem:[#allocation13 + $0x28] sm:$0xff] %v3162_v17  ;;  %v3164_v31 = vadd.f32 %v2396_v30, %v4262_v32 }
 0x2c3   :  { %2673 = vst [vmem:[#allocation13 + $0x30] sm:$0xff] %v3163_v56 }
 0x2c4   :  { %2674 = vst [vmem:[#allocation13 + $0x38] sm:$0xff] %v3164_v31 }
 0x2c6   :  { %v2400_v61 = vpop.f32.mrb[8].mxu0 }
 0x2c7   :  { %v3165_v42 = vadd.f32 %v2400_v61, %v4260_v2  ;;  %v2402_v63 = vpop.f32.mrb[9].mxu0 }
 0x2c8   :  { %v3166_v28 = vadd.f32 %v2402_v63, %v4262_v32  ;;  %v2404_v21 = vpop.f32.mrb[10].mxu0 }
 0x2c9   :  { %2675 = vst [vmem:[#allocation13 + $0x40] sm:$0xff] %v3165_v42  ;;  %v3167_v29 = vadd.f32 %v2404_v21, %v4260_v2  ;;  %v2406_v33 = vpop.f32.mrb[11].mxu0 }
 0x2ca   :  { %2676 = vst [vmem:[#allocation13 + $0x48] sm:$0xff] %v3166_v28  ;;  %v3168_v36 = vadd.f32 %v2406_v33, %v4262_v32 }
 0x2cb   :  { %2677 = vst [vmem:[#allocation13 + $0x50] sm:$0xff] %v3167_v29 }
 0x2cc   :  { %2678 = vst [vmem:[#allocation13 + $0x58] sm:$0xff] %v3168_v36 }
 0x2ce   :  { %v2410_v37 = vpop.f32.mrb[12].mxu0 }
 0x2cf   :  { %v3169_v50 = vadd.f32 %v2410_v37, %v4260_v2  ;;  %v2412_v13 = vpop.f32.mrb[13].mxu0 }
 0x2d0   :  { %v3170_v47 = vadd.f32 %v2412_v13, %v4262_v32  ;;  %v2414_v40 = vpop.f32.mrb[14].mxu0  ;;  %v3181_v13 = vadd.f32 %v4150_v23, %v4260_v2  ;;  %v3189_v23 = vadd.f32 %v4164_v41, %v4260_v2  ;;  %v3197_v41 = vadd.f32 %v4178_v55, %v4260_v2 }
 0x2d1   :  { %2679 = vst [vmem:[#allocation13 + $0x60] sm:$0xff] %v3169_v50  ;;  %v3171_v24 = vadd.f32 %v2414_v40, %v4260_v2  ;;  %v2416_v6 = vpop.f32.mrb[15].mxu0  ;;  %v3205_v55 = vadd.f32 %v4192_v39, %v4260_v2  ;;  %v3213_v39 = vadd.f32 %v4206_v44, %v4260_v2  ;;  %v3221_v44 = vadd.f32 %v4219_v57, %v4260_v2 }
 0x2d2   :  { %2680 = vst [vmem:[#allocation13 + $0x68] sm:$0xff] %v3170_v47  ;;  %v3172_v27 = vadd.f32 %v2416_v6, %v4262_v32  ;;  %v3183_v47 = vadd.f32 %v4153_v18, %v4262_v32  ;;  %v3191_v18 = vadd.f32 %v4167_v45, %v4262_v32  ;;  %v3199_v45 = vadd.f32 %v4181_v34, %v4262_v32 }
 0x2d3   :  { %2681 = vst [vmem:[#allocation13 + $0x70] sm:$0xff] %v3171_v24  ;;  %v3185_v24 = vadd.f32 %v4155_v25, %v4260_v2  ;;  %v3207_v34 = vadd.f32 %v4195_v43, %v4262_v32  ;;  %v3215_v43 = vadd.f32 %v4209_v51, %v4262_v32  ;;  %v3223_v51 = vadd.f32 %v4221_v22, %v4262_v32 }
 0x2d4   :  { %2682 = vst [vmem:[#allocation13 + $0x78] sm:$0xff] %v3172_v27  ;;  %v3229_v57 = vadd.f32 %v4228_v0, %v4260_v2  ;;  %v3231_v22 = vadd.f32 %v4230_v12, %v4262_v32  ;;  %v3237_v0 = vadd.f32 %v4236_v5, %v4260_v2  ;;  %v3239_v12 = vadd.f32 %v4238_v7, %v4262_v32 }
 0x2d5   :  { %v3245_v5 = vadd.f32 %v4244_v10, %v4260_v2  ;;  %v3247_v7 = vadd.f32 %v4246_v11, %v4262_v32  ;;  %v3253_v10 = vadd.f32 %v4252_v4, %v4260_v2  ;;  %v3255_v11 = vadd.f32 %v4254_v16, %v4262_v32 }
 0x2d6   :  { %v2420_v52 = vpop.f32.mrb[16].mxu0 }
 0x2d7   :  { %v3173_v17 = vadd.f32 %v2420_v52, %v4260_v2  ;;  %v2422_v53 = vpop.f32.mrb[17].mxu0  ;;  %v3187_v52 = vadd.f32 %v4158_v46, %v4262_v32 }
 0x2d8   :  { %v3174_v56 = vadd.f32 %v2422_v53, %v4262_v32  ;;  %v2424_v30 = vpop.f32.mrb[18].mxu0 }
 0x2d9   :  { %2683 = vst [vmem:[#allocation13 + $0x80] sm:$0xff] %v3173_v17  ;;  %v3175_v31 = vadd.f32 %v2424_v30, %v4260_v2  ;;  %v2426_v61 = vpop.f32.mrb[19].mxu0 }
 0x2da   :  { %2684 = vst [vmem:[#allocation13 + $0x88] sm:$0xff] %v3174_v56  ;;  %v3176_v42 = vadd.f32 %v2426_v61, %v4262_v32  ;;  %v3193_v61 = vadd.f32 %v4169_v48, %v4260_v2 }
 0x2db   :  { %2685 = vst [vmem:[#allocation13 + $0x90] sm:$0xff] %v3175_v31 }
 0x2dc   :  { %2686 = vst [vmem:[#allocation13 + $0x98] sm:$0xff] %v3176_v42 }
 0x2de   :  { %v2430_v63 = vpop.f32.mrb[20].mxu0 }
 0x2df   :  { %v3177_v28 = vadd.f32 %v2430_v63, %v4260_v2  ;;  %v2432_v21 = vpop.f32.mrb[21].mxu0  ;;  %v3195_v63 = vadd.f32 %v4172_v54, %v4262_v32 }
 0x2e0   :  { %v3178_v29 = vadd.f32 %v2432_v21, %v4262_v32  ;;  %v2434_v33 = vpop.f32.mrb[22].mxu0 }
 0x2e1   :  { %2687 = vst [vmem:[#allocation13 + $0xa0] sm:$0xff] %v3177_v28  ;;  %v3179_v36 = vadd.f32 %v2434_v33, %v4260_v2  ;;  %v2436_v37 = vpop.f32.mrb[23].mxu0 }
 0x2e2   :  { %2688 = vst [vmem:[#allocation13 + $0xa8] sm:$0xff] %v3178_v29  ;;  %v3180_v50 = vadd.f32 %v2436_v37, %v4262_v32  ;;  %v3201_v37 = vadd.f32 %v4183_v35, %v4260_v2 }
 0x2e3   :  { %2689 = vst [vmem:[#allocation13 + $0xb0] sm:$0xff] %v3179_v36 }
 0x2e4   :  { %2690 = vst [vmem:[#allocation13 + $0xb8] sm:$0xff] %v3180_v50 }
 0x2e6   :  { %v2440_v40 = vpop.f32.mrb[128].mxu1 }
 0x2e7   :  { %v3182_v6 = vadd.f32 %v3181_v13, %v2440_v40  ;;  %v2442_v27 = vpop.f32.mrb[129].mxu1  ;;  %v3203_v13 = vadd.f32 %v4186_v62, %v4262_v32 }
 0x2e8   :  { %v3184_v17 = vadd.f32 %v3183_v47, %v2442_v27  ;;  %v2444_v53 = vpop.f32.mrb[130].mxu1 }
 0x2e9   :  { %2691 = vst [vmem:[#allocation13 + $0xc0] sm:$0xff] %v3182_v6  ;;  %v3186_v56 = vadd.f32 %v3185_v24, %v2444_v53  ;;  %v2446_v30 = vpop.f32.mrb[131].mxu1  ;;  %v3211_v53 = vadd.f32 %v4200_v8, %v4262_v32 }
 0x2ea   :  { %2692 = vst [vmem:[#allocation13 + $0xc8] sm:$0xff] %v3184_v17  ;;  %v3188_v31 = vadd.f32 %v3187_v52, %v2446_v30  ;;  %v3209_v52 = vadd.f32 %v4197_v26, %v4260_v2 }
 0x2eb   :  { %2693 = vst [vmem:[#allocation13 + $0xd0] sm:$0xff] %v3186_v56 }
 0x2ec   :  { %2694 = vst [vmem:[#allocation13 + $0xd8] sm:$0xff] %v3188_v31 }
 0x2ee   :  { %v2450_v25 = vpop.f32.mrb[132].mxu1 }
 0x2ef   :  { %v3190_v46 = vadd.f32 %v3189_v23, %v2450_v25  ;;  %v2452_v42 = vpop.f32.mrb[133].mxu1  ;;  %v3217_v25 = vadd.f32 %v4211_v49, %v4260_v2 }
 0x2f0   :  { %v3192_v28 = vadd.f32 %v3191_v18, %v2452_v42  ;;  %v2454_v21 = vpop.f32.mrb[134].mxu1 }
 0x2f1   :  { %2695 = vst [vmem:[#allocation13 + $0xe0] sm:$0xff] %v3190_v46  ;;  %v3194_v29 = vadd.f32 %v3193_v61, %v2454_v21  ;;  %v2456_v33 = vpop.f32.mrb[135].mxu1  ;;  %v3219_v46 = vadd.f32 %v4214_v9, %v4262_v32 }
 0x2f2   :  { %2696 = vst [vmem:[#allocation13 + $0xe8] sm:$0xff] %v3192_v28  ;;  %v3196_v36 = vadd.f32 %v3195_v63, %v2456_v33  ;;  %v3225_v33 = vadd.f32 %v4223_v60, %v4260_v2 }
 0x2f3   :  { %2697 = vst [vmem:[#allocation13 + $0xf0] sm:$0xff] %v3194_v29 }
 0x2f4   :  { %2698 = vst [vmem:[#allocation13 + $0xf8] sm:$0xff] %v3196_v36 }
 0x2f6   :  { %v2460_v48 = vpop.f32.mrb[136].mxu1 }
 0x2f7   :  { %v3198_v54 = vadd.f32 %v3197_v41, %v2460_v48  ;;  %v2462_v50 = vpop.f32.mrb[137].mxu1  ;;  %v3227_v41 = vadd.f32 %v4225_v58, %v4262_v32 }
 0x2f8   :  { %v3200_v47 = vadd.f32 %v3199_v45, %v2462_v50  ;;  %v2464_v40 = vpop.f32.mrb[138].mxu1 }
 0x2f9   :  { %2699 = vst [vmem:[#allocation13 + $0x100] sm:$0xff] %v3198_v54  ;;  %v3202_v24 = vadd.f32 %v3201_v37, %v2464_v40  ;;  %v2466_v6 = vpop.f32.mrb[139].mxu1  ;;  %v3235_v40 = vadd.f32 %v4234_v3, %v4262_v32 }
 0x2fa   :  { %2700 = vst [vmem:[#allocation13 + $0x108] sm:$0xff] %v3200_v47  ;;  %v3204_v27 = vadd.f32 %v3203_v13, %v2466_v6  ;;  %v3233_v13 = vadd.f32 %v4232_v1, %v4260_v2 }
 0x2fb   :  { %2701 = vst [vmem:[#allocation13 + $0x110] sm:$0xff] %v3202_v24 }
 0x2fc   :  { %2702 = vst [vmem:[#allocation13 + $0x118] sm:$0xff] %v3204_v27 }
 0x2fe   :  { %v2470_v35 = vpop.f32.mrb[140].mxu1 }
 0x2ff   :  { %v3206_v62 = vadd.f32 %v3205_v55, %v2470_v35  ;;  %v2472_v17 = vpop.f32.mrb[141].mxu1  ;;  %v3241_v35 = vadd.f32 %v4240_v59, %v4260_v2 }
 0x300   :  { %v3208_v56 = vadd.f32 %v3207_v34, %v2472_v17  ;;  %v2474_v30 = vpop.f32.mrb[142].mxu1 }
 0x301   :  { %2703 = vst [vmem:[#allocation13 + $0x120] sm:$0xff] %v3206_v62  ;;  %v3210_v31 = vadd.f32 %v3209_v52, %v2474_v30  ;;  %v2476_v23 = vpop.f32.mrb[143].mxu1  ;;  %v3243_v62 = vadd.f32 %v4242_v15, %v4262_v32 }
 0x302   :  { %2704 = vst [vmem:[#allocation13 + $0x128] sm:$0xff] %v3208_v56  ;;  %v3212_v18 = vadd.f32 %v3211_v53, %v2476_v23  ;;  %v3249_v23 = vadd.f32 %v4248_v38, %v4260_v2 }
 0x303   :  { %2705 = vst [vmem:[#allocation13 + $0x130] sm:$0xff] %v3210_v31 }
 0x304   :  { %2706 = vst [vmem:[#allocation13 + $0x138] sm:$0xff] %v3212_v18 }
 0x306   :  { %v2480_v26 = vpop.f32.mrb[144].mxu1 }
 0x307   :  { %v3214_v8 = vadd.f32 %v3213_v39, %v2480_v26  ;;  %v2482_v61 = vpop.f32.mrb[145].mxu1  ;;  %v3251_v39 = vadd.f32 %v4250_v14, %v4262_v32 }
 0x308   :  { %v3216_v42 = vadd.f32 %v3215_v43, %v2482_v61  ;;  %v2484_v63 = vpop.f32.mrb[146].mxu1 }
 0x309   :  { %2707 = vst [vmem:[#allocation13 + $0x140] sm:$0xff] %v3214_v8  ;;  %v3218_v28 = vadd.f32 %v3217_v25, %v2484_v63  ;;  %v2486_v21 = vpop.f32.mrb[147].mxu1  ;;  %v3259_v63 = vadd.f32 %v4258_v20, %v4262_v32 }
 0x30a   :  { %2708 = vst [vmem:[#allocation13 + $0x148] sm:$0xff] %v3216_v42  ;;  %v3220_v29 = vadd.f32 %v3219_v46, %v2486_v21  ;;  %v3257_v46 = vadd.f32 %v4256_v19, %v4260_v2 }
 0x30b   :  { %2709 = vst [vmem:[#allocation13 + $0x150] sm:$0xff] %v3218_v28 }
 0x30c   :  { %2710 = vst [vmem:[#allocation13 + $0x158] sm:$0xff] %v3220_v29 }
 0x30e   :  { %v2490_v49 = vpop.f32.mrb[148].mxu1 }
 0x30f   :  { %v3222_v9 = vadd.f32 %v3221_v44, %v2490_v49  ;;  %v2492_v36 = vpop.f32.mrb[149].mxu1 }
 0x310   :  { %v3224_v45 = vadd.f32 %v3223_v51, %v2492_v36  ;;  %v2494_v48 = vpop.f32.mrb[150].mxu1 }
 0x311   :  { %2711 = vst [vmem:[#allocation13 + $0x160] sm:$0xff] %v3222_v9  ;;  %v3226_v37 = vadd.f32 %v3225_v33, %v2494_v48  ;;  %v2496_v54 = vpop.f32.mrb[151].mxu1 }
 0x312   :  { %2712 = vst [vmem:[#allocation13 + $0x168] sm:$0xff] %v3224_v45  ;;  %v3228_v50 = vadd.f32 %v3227_v41, %v2496_v54 }
 0x313   :  { %2713 = vst [vmem:[#allocation13 + $0x170] sm:$0xff] %v3226_v37 }
 0x314   :  { %2714 = vst [vmem:[#allocation13 + $0x178] sm:$0xff] %v3228_v50 }
 0x316   :  { %v2500_v60 = vpop.f32.mrb[152].mxu1 }
 0x317   :  { %v3230_v58 = vadd.f32 %v3229_v57, %v2500_v60  ;;  %v2502_v47 = vpop.f32.mrb[153].mxu1 }
 0x318   :  { %v3232_v24 = vadd.f32 %v3231_v22, %v2502_v47  ;;  %v2504_v6 = vpop.f32.mrb[154].mxu1 }
 0x319   :  { %2715 = vst [vmem:[#allocation13 + $0x180] sm:$0xff] %v3230_v58  ;;  %v3234_v27 = vadd.f32 %v3233_v13, %v2504_v6  ;;  %v2506_v55 = vpop.f32.mrb[155].mxu1 }
 0x31a   :  { %2716 = vst [vmem:[#allocation13 + $0x188] sm:$0xff] %v3232_v24  ;;  %v3236_v34 = vadd.f32 %v3235_v40, %v2506_v55 }
 0x31b   :  { %2717 = vst [vmem:[#allocation13 + $0x190] sm:$0xff] %v3234_v27 }
 0x31c   :  { %2718 = vst [vmem:[#allocation13 + $0x198] sm:$0xff] %v3236_v34 }
 0x31e   :  { %v2510_v1 = vpop.f32.mrb[156].mxu1 }
 0x31f   :  { %v3238_v3 = vadd.f32 %v3237_v0, %v2510_v1  ;;  %v2512_v52 = vpop.f32.mrb[157].mxu1 }
 0x320   :  { %v3240_v17 = vadd.f32 %v3239_v12, %v2512_v52  ;;  %v2514_v53 = vpop.f32.mrb[158].mxu1 }
 0x321   :  { %2719 = vst [vmem:[#allocation13 + $0x1a0] sm:$0xff] %v3238_v3  ;;  %v3242_v56 = vadd.f32 %v3241_v35, %v2514_v53  ;;  %v2516_v30 = vpop.f32.mrb[159].mxu1 }
 0x322   :  { %2720 = vst [vmem:[#allocation13 + $0x1a8] sm:$0xff] %v3240_v17  ;;  %v3244_v31 = vadd.f32 %v3243_v62, %v2516_v30 }
 0x323   :  { %2721 = vst [vmem:[#allocation13 + $0x1b0] sm:$0xff] %v3242_v56 }
 0x324   :  { %2722 = vst [vmem:[#allocation13 + $0x1b8] sm:$0xff] %v3244_v31 }
 0x326   :  { %v2520_v59 = vpop.f32.mrb[160].mxu1 }
 0x327   :  { %v3246_v15 = vadd.f32 %v3245_v5, %v2520_v59  ;;  %v2522_v18 = vpop.f32.mrb[161].mxu1 }
 0x328   :  { %v3248_v43 = vadd.f32 %v3247_v7, %v2522_v18  ;;  %v2524_v26 = vpop.f32.mrb[162].mxu1 }
 0x329   :  { %2723 = vst [vmem:[#allocation13 + $0x1c0] sm:$0xff] %v3246_v15  ;;  %v3250_v25 = vadd.f32 %v3249_v23, %v2524_v26  ;;  %v2526_v8 = vpop.f32.mrb[163].mxu1 }
 0x32a   :  { %2724 = vst [vmem:[#allocation13 + $0x1c8] sm:$0xff] %v3248_v43  ;;  %v3252_v61 = vadd.f32 %v3251_v39, %v2526_v8 }
 0x32b   :  { %2725 = vst [vmem:[#allocation13 + $0x1d0] sm:$0xff] %v3250_v25 }
 0x32c   :  { %2726 = vst [vmem:[#allocation13 + $0x1d8] sm:$0xff] %v3252_v61 }
 0x32e   :  { %v2530_v38 = vpop.f32.mrb[164].mxu1 }
 0x32f   :  { %v3254_v14 = vadd.f32 %v3253_v10, %v2530_v38  ;;  %v2532_v42 = vpop.f32.mrb[165].mxu1 }
 0x330   :  { %v3256_v28 = vadd.f32 %v3255_v11, %v2532_v42  ;;  %v2534_v21 = vpop.f32.mrb[166].mxu1 }
 0x331   :  { %2727 = vst [vmem:[#allocation13 + $0x1e0] sm:$0xff] %v3254_v14  ;;  %v3258_v29 = vadd.f32 %v3257_v46, %v2534_v21  ;;  %v2536_v44 = vpop.f32.mrb[167].mxu1 }
 0x332   :  { %2728 = vst [vmem:[#allocation13 + $0x1e8] sm:$0xff] %v3256_v28  ;;  %v3260_v4 = vadd.f32 %v3259_v63, %v2536_v44 }
 0x333   :  { %2729 = vst [vmem:[#allocation13 + $0x1f0] sm:$0xff] %v3258_v29 }
 0x334   :  { %2730 = vst [vmem:[#allocation13 + $0x1f8] sm:$0xff] %v3260_v4 }
 0x335   :  { %3710 = shalt.err (!%p3707_p2)
}
 0x336   :  { %s3711_s9 = scalar_lea.hbm %s4388_s5, 8192 }
 0x337   :  { %p3712_p3 = scmp.ne.s32.totalorder %s4388_s5, %s3711_s9  ;;  %p3715_p4 = scmp.lt.u32.totalorder %s3711_s9, %s4388_s5 }
 0x339   :  { %p3717_p5 = pnand %p3715_p4, %p3712_p3 }
 0x33b   :  { %3720 = shalt.err (!%p3717_p5)
}
 0x33c   :  { %2742 = dma.vmem_to_hbm [thread:$0]  %s2737_s29, 8192, %s4388_s5, [#allocation6], %s3736_s3, %s3736_s3, %s3737_s30  }
 0x33d   :  { %3727 = dma.done.wait [#allocation6], 8192  }
 0x33e   :  { %3728 = vsyncadd [#allocation6], 4294959104 }
 0x33f   :  { %2746 = vsyncpa [#allocation5], 1 }
 0x340   :  { %2747 = vsyncpa [#allocation8], 1 }
 0x341   :  { %2748 = vsyncpa [#allocation11], 1 }
 0x342   :  { %2749 = vsyncpa [#allocation6], 1 }

</bundles_post_ra>
